<compile_context>
chip_gen: v7x
topology: tpu7x:2x2x1
jax: 0.10.0
libtpu: 0.0.40
codegen_flags: <defaults>
</compile_context>

<pallas_src>
import jax
import jax.numpy as jnp
from jax.experimental import pallas as pl
from jax.experimental.pallas import tpu as pltpu

EPS = 1e-5  # nn.LayerNorm default eps


def _layer_norm(v, gamma, beta):
    mu = jnp.mean(v, axis=-1, keepdims=True)
    var = jnp.mean(jnp.square(v - mu), axis=-1, keepdims=True)
    return (v - mu) * jax.lax.rsqrt(var + EPS) * gamma + beta


def sconv_block_kernel(x_ref, hre_ref, him_ref,
                       phr_ref, phi_ref, air_ref, aii_ref,
                       pre_ref, pim_ref, g_ref, b_ref,
                       fcw_ref, fcb_ref, w1_ref, b1_ref, w2_ref, b2_ref,
                       out_ref, hore_ref, hoim_ref):
    bt, seq, dim = x_ref.shape
    hdim = w1_ref.shape[1]
    rows = bt * seq

    xb = x_ref[...]                       # (bt, L, D) f32 original input block
    x2d = xb.reshape(rows, dim)           # flat rows -> tall M for the MXU
    gamma = g_ref[...]                    # (1, D) shared LayerNorm affine
    beta = b_ref[...]

    # ---- LayerNorm 1 (single shared nn.LayerNorm in the torch block) ----
    xn = _layer_norm(x2d, gamma, beta)    # (rows, D)

    # ---- SConvLayer causal complex conv as a log-depth decayed prefix scan ----
    #   c[t] = phz * c[t-1] + xn[t]  (complex, per (batch, dim));  conv = phazor_init*c
    # Hillis-Steele doubling on the flattened (rows, D) view.  The roll wraps across
    # sequence/batch boundaries, but exactly those positions (t < k within each
    # sequence) are masked to zero, so the flattened roll is exact.
    phr = phr_ref[...]                    # (1, D)  Re(phazor)
    phi = phi_ref[...]                    # (1, D)  Im(phazor)
    cr = xn                               # Re(c);  Im starts at 0 (x is real)
    ci = jnp.zeros_like(xn)
    pkr, pki = phr, phi                   # phz^(2^j)
    t_idx = jax.lax.broadcasted_iota(jnp.int32, (bt, seq, dim), 1).reshape(rows, dim)
    k = 1
    while k < seq:                        # ceil(log2(L)) fully vectorized steps
        valid = t_idx >= k
        sr = jnp.where(valid, pltpu.roll(cr, shift=k, axis=0), 0.0)
        si = jnp.where(valid, pltpu.roll(ci, shift=k, axis=0), 0.0)
        cr, ci = cr + pkr * sr - pki * si, ci + pkr * si + pki * sr
        pkr, pki = pkr * pkr - pki * pki, 2.0 * pkr * pki
        k *= 2
    # TODO(synk): for very long L (>=2048) a two-level chunked scan (Hillis-Steele
    # within 128-256 element chunks + a short sequential carry) would cut VPU work
    # another 20-30% on v6e/v7x.

    air = air_ref[...]                    # (1, D)  Re(phazor_init)
    aii = aii_ref[...]                    # (1, D)  Im(phazor_init)
    conv_re = air * cr - aii * ci         # (rows, D)
    conv_im = air * ci + aii * cr

    # + hidden * phazor_progression * phazor  ("past" multiplier, (L, D), bf16 input)
    hre = hre_ref[...]                    # (bt, 1, D)
    him = him_ref[...]
    pre = pre_ref[...].astype(jnp.float32)[None]   # (1, L, D)
    pim = pim_ref[...].astype(jnp.float32)[None]
    cwp_re = conv_re + (hre * pre - him * pim).reshape(rows, dim)
    cwp_im = conv_im + (hre * pim + him * pre).reshape(rows, dim)
    # Store conv_with_past (bf16 by default) as whole-block dense stores.
    hore_ref[...] = cwp_re.reshape(bt, seq, dim).astype(hore_ref.dtype)
    hoim_ref[...] = cwp_im.reshape(bt, seq, dim).astype(hoim_ref.dtype)

    # ---- gating branch y = SiLU(fc(x)) on the un-normalized input ----
    y = jnp.dot(x2d.astype(jnp.bfloat16), fcw_ref[...],
                preferred_element_type=jnp.float32) + fcb_ref[...]
    y = y * jax.nn.sigmoid(y)

    # TODO(synk): nn.Dropout is treated as identity (eval-mode semantics).
    z = cwp_re * y + x2d                  # first residual (f32)

    # ---- LayerNorm 2 (same affine) + FFN (Linear -> SiLU -> Linear) + residual ----
    zn = _layer_norm(z, gamma, beta)
    znb = zn.astype(jnp.bfloat16)

    # FFN evaluated in hidden-dim chunks so the (rows, H) f32 intermediate never
    # materializes at production H; SiLU and the bf16 cast are fused per chunk.
    hc = hdim if (hdim <= 1024 or hdim % 1024 != 0) else 1024
    ff = jnp.zeros((rows, dim), jnp.float32)
    for c in range(hdim // hc):
        lo, hi = c * hc, (c + 1) * hc
        h1 = jnp.dot(znb, w1_ref[:, lo:hi],
                     preferred_element_type=jnp.float32) + b1_ref[:, lo:hi]
        h1b = (h1 * jax.nn.sigmoid(h1)).astype(jnp.bfloat16)
        ff = ff + jnp.dot(h1b, w2_ref[lo:hi, :], preferred_element_type=jnp.float32)
    ff = ff + b2_ref[...]
    # TODO(synk): on v7x, stream w1/w2 from HBM (memory_space=pl.ANY + emit_pipeline)
    # and/or quantize weights to fp8 to drop them from resident VMEM entirely.

    out_ref[...] = (ff + z).reshape(bt, seq, dim)


def _vmem_capacity_bytes():
    try:
        cap = getattr(pltpu.get_tpu_info(), "vmem_capacity_bytes", None)
        if cap:
            return int(cap)
    except Exception:
        pass
    return 128 * 1024 * 1024


def _choose_batch_tile(batch, seq_len, dim, hdim, vmem_bytes, cwp_bytes):
    """VMEM-aware batch tile.  Hard requirement: >=2 grid steps whenever B > 1, so
    the BlockSpec pipeline overlaps DMA with compute and both TCs get work."""
    divisors = [d for d in range(1, batch + 1) if batch % d == 0]
    if batch > 1:
        divisors = [d for d in divisors if batch // d >= 2]

    # Single-buffered constants: bf16 weights + bf16 past tables.
    fixed = 2 * (dim * dim + 2 * dim * hdim) + 2 * 2 * seq_len * dim

    def per_step(bt):
        rows = bt * seq_len
        io = rows * dim * 2 * (4 + 4 + 2 * cwp_bytes)   # double-buffered x / out / cwp
        live = rows * dim * 4 * 12                      # scan / conv / residual temps
        live += rows * min(hdim, 1024) * 4 * 2          # FFN hidden chunk
        return io + live

    budget = int(vmem_bytes * 0.8) - fixed
    target_rows = 512 if vmem_bytes >= 96 * 1024 * 1024 else 256
    fit = [d for d in divisors if per_step(d) <= budget and d * seq_len <= target_rows]
    if fit:
        return max(fit)
    ok = [d for d in divisors if per_step(d) <= budget]
    return max(ok) if ok else min(divisors)


def sconv_block_forward(x, hidden_re, hidden_im, params, *, batch_tile=None,
                        cwp_dtype=jnp.bfloat16):
    B, L, D = x.shape
    H = params["w1"].shape[1]
    vmem_cap = _vmem_capacity_bytes()
    cwp_bytes = jnp.dtype(cwp_dtype).itemsize
    bt = batch_tile or _choose_batch_tile(B, L, D, H, vmem_cap, cwp_bytes)
    assert B % bt == 0, "batch tile must divide batch"

    # ---- parameter-only derivations (tiny, plain JAX) ----
    pr, pi = params["phazor_re"], params["phazor_im"]
    mag = jnp.exp(-(pr * pr + pi * pi))
    ang = jnp.arctan2(pi, pr)
    phz = (mag * jnp.cos(ang) + 1j * mag * jnp.sin(ang)).astype(jnp.complex64)
    init = (params["phazor_init_re"]
            + 1j * params["phazor_init_im"]).astype(jnp.complex64)
    prog = phz[None, :] ** jnp.arange(L, dtype=jnp.float32)[:, None]   # (L, D) phz^t
    past = prog * phz[None, :]                                         # (L, D) phz^(t+1)

    phz_re = jnp.real(phz).reshape(1, D).astype(jnp.float32)
    phz_im = jnp.imag(phz).reshape(1, D).astype(jnp.float32)
    init_re = jnp.real(init).reshape(1, D).astype(jnp.float32)
    init_im = jnp.imag(init).reshape(1, D).astype(jnp.float32)
    past_re = jnp.real(past).astype(jnp.bfloat16)     # bf16 tables: half VMEM / DMA
    past_im = jnp.imag(past).astype(jnp.bfloat16)

    gamma = params["gamma"].reshape(1, D).astype(jnp.float32)
    beta = params["beta"].reshape(1, D).astype(jnp.float32)
    fc_w = params["fc_w"].astype(jnp.bfloat16)        # bf16 weights for the MXU
    w1 = params["w1"].astype(jnp.bfloat16)
    w2 = params["w2"].astype(jnp.bfloat16)
    fc_b = params["fc_b"].reshape(1, D).astype(jnp.float32)
    b1 = params["b1"].reshape(1, H).astype(jnp.float32)
    b2 = params["b2"].reshape(1, D).astype(jnp.float32)

    h_re = hidden_re.reshape(B, 1, D).astype(jnp.float32)
    h_im = hidden_im.reshape(B, 1, D).astype(jnp.float32)

    block = pl.BlockSpec((bt, L, D), lambda b: (b, 0, 0))
    hid = pl.BlockSpec((bt, 1, D), lambda b: (b, 0, 0))

    def const(shape):
        nd = len(shape)
        # Constant index_map => single-buffer (double-buffering weights/tables only
        # duplicates them in VMEM).
        return pl.BlockSpec(shape, lambda b: (0,) * nd,
                            pipeline_mode=pl.Buffered(1))

    out_shape = (
        jax.ShapeDtypeStruct((B, L, D), jnp.float32),   # block output
        jax.ShapeDtypeStruct((B, L, D), cwp_dtype),     # Re(conv_with_past)
        jax.ShapeDtypeStruct((B, L, D), cwp_dtype),     # Im(conv_with_past)
    )

    vmem_limit = min(int(vmem_cap * 0.85), 100 * 1024 * 1024)

    return pl.pallas_call(
        sconv_block_kernel,
        grid=(B // bt,),
        in_specs=[
            block, hid, hid,
            const((1, D)), const((1, D)),     # phazor re / im
            const((1, D)), const((1, D)),     # phazor_init re / im
            const((L, D)), const((L, D)),     # hidden "past" multiplier re / im (bf16)
            const((1, D)), const((1, D)),     # shared LayerNorm gamma / beta
            const((D, D)), const((1, D)),     # fc weight (in,out) / bias
            const((D, H)), const((1, H)),     # ffn linear_1 weight / bias
            const((H, D)), const((1, D)),     # ffn linear_2 weight / bias
        ],
        out_specs=(block, block, block),
        out_shape=out_shape,
        compiler_params=pltpu.CompilerParams(
            dimension_semantics=("parallel",),
            vmem_limit_bytes=vmem_limit),
    )(x, h_re, h_im, phz_re, phz_im, init_re, init_im, past_re, past_im,
      gamma, beta, fc_w, fc_b, w1, b1, w2, b2)


def make_params(key, dim, dim_ff_hidden):
    ks = jax.random.split(key, 9)

    # SConvLayer raw parameters (matching the torch __init__ distributions)
    init_re = jax.random.normal(ks[0], (dim,), jnp.float32)
    init_im = jax.random.normal(ks[1], (dim,), jnp.float32)
    mag0 = jnp.abs(jax.random.normal(ks[2], (dim,), jnp.float32))
    ang0 = 2.0 * jnp.pi * jnp.arange(dim, dtype=jnp.float32) / dim
    phazor_re = mag0 * jnp.cos(ang0)
    phazor_im = mag0 * jnp.sin(ang0)

    def lin_w(k, fan_in, shape):
        return jax.random.normal(k, shape, jnp.float32) / jnp.sqrt(fan_in)

    return dict(
        phazor_init_re=init_re, phazor_init_im=init_im,
        phazor_re=phazor_re, phazor_im=phazor_im,
        gamma=jnp.ones((dim,), jnp.float32),
        beta=jnp.zeros((dim,), jnp.float32),
        fc_w=lin_w(ks[3], dim, (dim, dim)),                 # stored as (in, out)
        fc_b=0.1 * jax.random.normal(ks[4], (dim,), jnp.float32),
        w1=lin_w(ks[5], dim, (dim, dim_ff_hidden)),
        b1=0.1 * jax.random.normal(ks[6], (dim_ff_hidden,), jnp.float32),
        w2=lin_w(ks[7], dim_ff_hidden, (dim_ff_hidden, dim)),
        b2=0.1 * jax.random.normal(ks[8], (dim,), jnp.float32),
    )


def reference_forward(x, h_re, h_im, p):
    """Pure-JAX f32 reference using the explicit causal Toeplitz formulation
    (independent of the kernel's scan algorithm), for validation."""
    B, L, D = x.shape
    gamma, beta = p["gamma"], p["beta"]

    def ln(v):
        mu = v.mean(-1, keepdims=True)
        var = ((v - mu) ** 2).mean(-1, keepdims=True)
        return (v - mu) / jnp.sqrt(var + EPS) * gamma + beta

    pr, pi = p["phazor_re"], p["phazor_im"]
    mag = jnp.exp(-(pr * pr + pi * pi))
    ang = jnp.arctan2(pi, pr)
    phz = (mag * jnp.cos(ang) + 1j * mag * jnp.sin(ang)).astype(jnp.complex64)
    init = (p["phazor_init_re"] + 1j * p["phazor_init_im"]).astype(jnp.complex64)
    prog = phz[None, :] ** jnp.arange(L, dtype=jnp.float32)[:, None]
    filt = prog * init[None, :]                      # (L, D)
    past = prog * phz[None, :]                       # (L, D)

    # causal Toeplitz: filter_full[t, s, d] = filt[t-s, d] for s <= t, else 0
    t_idx = jnp.arange(L)[:, None]
    s_idx = jnp.arange(L)[None, :]
    diff = t_idx - s_idx
    filter_full = filt[jnp.clip(diff, 0, L - 1)] * (diff >= 0)[:, :, None]
    fre = jnp.real(filter_full).astype(jnp.float32)
    fim = jnp.imag(filter_full).astype(jnp.float32)
    pre = jnp.real(past).astype(jnp.float32)
    pim = jnp.imag(past).astype(jnp.float32)

    xn = ln(x)
    conv_re = jnp.einsum("tsd,bsd->btd", fre, xn)
    conv_im = jnp.einsum("tsd,bsd->btd", fim, xn)
    cwp_re = conv_re + h_re[:, None, :] * pre[None] - h_im[:, None, :] * pim[None]
    cwp_im = conv_im + h_re[:, None, :] * pim[None] + h_im[:, None, :] * pre[None]

    y = x @ p["fc_w"] + p["fc_b"]
    y = y * jax.nn.sigmoid(y)
    z = cwp_re * y + x
    zn = ln(z)
    h1 = zn @ p["w1"] + p["b1"]
    h1 = h1 * jax.nn.sigmoid(h1)
    out = h1 @ p["w2"] + p["b2"] + z
    return out, cwp_re, cwp_im


if __name__ == "__main__":
    B, L, D, H = 2, 8, 8, 32   # batch, seq_len, dim, dim_ff_hidden (demo sizes;
                               # production D/H should be multiples of 128 so stores
                               # and MXU tiles are lane-dense)

    key = jax.random.PRNGKey(0)
    kx, kh1, kh2, kp = jax.random.split(key, 4)
    x = jax.random.normal(kx, (B, L, D), jnp.float32)
    hidden_re = jax.random.normal(kh1, (B, D), jnp.float32)
    hidden_im = jax.random.normal(kh2, (B, D), jnp.float32)
    params = make_params(kp, D, H)

    out, hid_re, hid_im = sconv_block_forward(x, hidden_re, hidden_im, params)
    jax.block_until_ready((out, hid_re, hid_im))

    ref_out, ref_hre, ref_him = reference_forward(x, hidden_re, hidden_im, params)

    def rel_err(a, b):
        a32 = a.astype(jnp.float32)
        return float(jnp.max(jnp.abs(a32 - b))) / (float(jnp.max(jnp.abs(b))) + 1e-6)

    # hidden is stored as bf16 (and uses bf16 past tables) -> ~0.4% worst case
    err_hid = max(rel_err(hid_re, ref_hre), rel_err(hid_im, ref_him))
    err_out = rel_err(out, ref_out)                  # bf16 matmul path
    assert err_hid < 1e-2, f"hidden mismatch vs reference: {err_hid}"
    assert err_out < 3e-2, f"output mismatch vs reference: {err_out}"
    print("KERNEL_OK")
</pallas_src>

<mosaic_0001>
module attributes {stable_mosaic.version = 11 : i64} {
  func.func @sconv_block_kernel(%arg0: i32, %arg1: memref<1x8x8xf32, #tpu.memory_space<vmem>>, %arg2: memref<1x1x8xf32, #tpu.memory_space<vmem>>, %arg3: memref<1x1x8xf32, #tpu.memory_space<vmem>>, %arg4: memref<1x8xf32, #tpu.memory_space<vmem>>, %arg5: memref<1x8xf32, #tpu.memory_space<vmem>>, %arg6: memref<1x8xf32, #tpu.memory_space<vmem>>, %arg7: memref<1x8xf32, #tpu.memory_space<vmem>>, %arg8: memref<8x8xbf16, #tpu.memory_space<vmem>>, %arg9: memref<8x8xbf16, #tpu.memory_space<vmem>>, %arg10: memref<1x8xf32, #tpu.memory_space<vmem>>, %arg11: memref<1x8xf32, #tpu.memory_space<vmem>>, %arg12: memref<8x8xbf16, #tpu.memory_space<vmem>>, %arg13: memref<1x8xf32, #tpu.memory_space<vmem>>, %arg14: memref<8x32xbf16, #tpu.memory_space<vmem>>, %arg15: memref<1x32xf32, #tpu.memory_space<vmem>>, %arg16: memref<32x8xbf16, #tpu.memory_space<vmem>>, %arg17: memref<1x8xf32, #tpu.memory_space<vmem>>, %arg18: memref<1x8x8xf32, #tpu.memory_space<vmem>>, %arg19: memref<1x8x8xbf16, #tpu.memory_space<vmem>>, %arg20: memref<1x8x8xbf16, #tpu.memory_space<vmem>>) attributes {dimension_semantics = [#tpu.dimension_semantics<parallel>], iteration_bounds = array<i64: 2>, scalar_prefetch = 0 : i64, scratch_operands = 0 : i64, tpu.core_type = #tpu.core_type<tc>, window_params = [{transform_indices = @transform_0, window_bounds = array<i64: 1, 8, 8>}, {transform_indices = @transform_1, window_bounds = array<i64: 1, 1, 8>}, {transform_indices = @transform_2, window_bounds = array<i64: 1, 1, 8>}, {pipeline_mode = #tpu.pipeline_mode<synchronous>, transform_indices = @transform_3, window_bounds = array<i64: 1, 8>}, {pipeline_mode = #tpu.pipeline_mode<synchronous>, transform_indices = @transform_4, window_bounds = array<i64: 1, 8>}, {pipeline_mode = #tpu.pipeline_mode<synchronous>, transform_indices = @transform_5, window_bounds = array<i64: 1, 8>}, {pipeline_mode = #tpu.pipeline_mode<synchronous>, transform_indices = @transform_6, window_bounds = array<i64: 1, 8>}, {pipeline_mode = #tpu.pipeline_mode<synchronous>, transform_indices = @transform_7, window_bounds = array<i64: 8, 8>}, {pipeline_mode = #tpu.pipeline_mode<synchronous>, transform_indices = @transform_8, window_bounds = array<i64: 8, 8>}, {pipeline_mode = #tpu.pipeline_mode<synchronous>, transform_indices = @transform_9, window_bounds = array<i64: 1, 8>}, {pipeline_mode = #tpu.pipeline_mode<synchronous>, transform_indices = @transform_10, window_bounds = array<i64: 1, 8>}, {pipeline_mode = #tpu.pipeline_mode<synchronous>, transform_indices = @transform_11, window_bounds = array<i64: 8, 8>}, {pipeline_mode = #tpu.pipeline_mode<synchronous>, transform_indices = @transform_12, window_bounds = array<i64: 1, 8>}, {pipeline_mode = #tpu.pipeline_mode<synchronous>, transform_indices = @transform_13, window_bounds = array<i64: 8, 32>}, {pipeline_mode = #tpu.pipeline_mode<synchronous>, transform_indices = @transform_14, window_bounds = array<i64: 1, 32>}, {pipeline_mode = #tpu.pipeline_mode<synchronous>, transform_indices = @transform_15, window_bounds = array<i64: 32, 8>}, {pipeline_mode = #tpu.pipeline_mode<synchronous>, transform_indices = @transform_16, window_bounds = array<i64: 1, 8>}, {transform_indices = @transform_17, window_bounds = array<i64: 1, 8, 8>}, {transform_indices = @transform_18, window_bounds = array<i64: 1, 8, 8>}, {transform_indices = @transform_19, window_bounds = array<i64: 1, 8, 8>}]} {
    %c0 = arith.constant 0 : index
    %c0_0 = arith.constant 0 : index
    %c0_1 = arith.constant 0 : index
    %0 = vector.load %arg1[%c0, %c0_0, %c0_1] : memref<1x8x8xf32, #tpu.memory_space<vmem>>, vector<1x8x8xf32>
    %1 = vector.shape_cast %0 : vector<1x8x8xf32> to vector<8x8xf32>
    %c0_2 = arith.constant 0 : index
    %c0_3 = arith.constant 0 : index
    %2 = vector.load %arg10[%c0_2, %c0_3] : memref<1x8xf32, #tpu.memory_space<vmem>>, vector<1x8xf32>
    %c0_4 = arith.constant 0 : index
    %c0_5 = arith.constant 0 : index
    %3 = vector.load %arg11[%c0_4, %c0_5] : memref<1x8xf32, #tpu.memory_space<vmem>>, vector<1x8xf32>
    %cst = arith.constant dense<0.000000e+00> : vector<8xf32>
    %4 = vector.multi_reduction <add>, %1, %cst [1] : vector<8x8xf32> to vector<8xf32>
    %5 = vector.shape_cast %4 : vector<8xf32> to vector<8x1xf32>
    %cst_6 = arith.constant 8.000000e+00 : f32
    %6 = vector.broadcast %cst_6 : f32 to vector<8x1xf32>
    %7 = arith.divf %5, %6 : vector<8x1xf32>
    %8 = vector.broadcast %7 : vector<8x1xf32> to vector<8x8xf32>
    %9 = arith.subf %1, %8 : vector<8x8xf32>
    %10 = arith.mulf %9, %9 : vector<8x8xf32>
    %cst_7 = arith.constant dense<0.000000e+00> : vector<8xf32>
    %11 = vector.multi_reduction <add>, %10, %cst_7 [1] : vector<8x8xf32> to vector<8xf32>
    %12 = vector.shape_cast %11 : vector<8xf32> to vector<8x1xf32>
    %cst_8 = arith.constant 8.000000e+00 : f32
    %13 = vector.broadcast %cst_8 : f32 to vector<8x1xf32>
    %14 = arith.divf %12, %13 : vector<8x1xf32>
    %15 = vector.broadcast %7 : vector<8x1xf32> to vector<8x8xf32>
    %16 = arith.subf %1, %15 : vector<8x8xf32>
    %cst_9 = arith.constant 9.99999974E-6 : f32
    %17 = vector.broadcast %cst_9 : f32 to vector<8x1xf32>
    %18 = arith.addf %14, %17 : vector<8x1xf32>
    %19 = math.rsqrt %18 : vector<8x1xf32>
    %20 = vector.broadcast %19 : vector<8x1xf32> to vector<8x8xf32>
    %21 = arith.mulf %16, %20 : vector<8x8xf32>
    %22 = vector.broadcast %2 : vector<1x8xf32> to vector<8x8xf32>
    %23 = arith.mulf %21, %22 : vector<8x8xf32>
    %24 = vector.broadcast %3 : vector<1x8xf32> to vector<8x8xf32>
    %25 = arith.addf %23, %24 : vector<8x8xf32>
    %c0_10 = arith.constant 0 : index
    %c0_11 = arith.constant 0 : index
    %26 = vector.load %arg4[%c0_10, %c0_11] : memref<1x8xf32, #tpu.memory_space<vmem>>, vector<1x8xf32>
    %c0_12 = arith.constant 0 : index
    %c0_13 = arith.constant 0 : index
    %27 = vector.load %arg5[%c0_12, %c0_13] : memref<1x8xf32, #tpu.memory_space<vmem>>, vector<1x8xf32>
    %cst_14 = arith.constant 0.000000e+00 : f32
    %28 = vector.broadcast %cst_14 : f32 to vector<8x8xf32>
    %29 = tpu.iota {dimensions = array<i32: 1>} : vector<1x8x8xi32>
    %30 = vector.shape_cast %29 : vector<1x8x8xi32> to vector<8x8xi32>
    %c1_i32 = arith.constant 1 : i32
    %31 = vector.broadcast %c1_i32 : i32 to vector<8x8xi32>
    %32 = arith.cmpi sge, %30, %31 : vector<8x8xi32>
    %c1_i32_15 = arith.constant 1 : i32
    %33 = tpu.dynamic_rotate %25 by %c1_i32_15 dim 0 : vector<8x8xf32>, i32 -> vector<8x8xf32>
    %cst_16 = arith.constant 0.000000e+00 : f32
    %34 = vector.broadcast %cst_16 : f32 to vector<8x8xf32>
    %35 = arith.select %32, %33, %34 : vector<8x8xi1>, vector<8x8xf32>
    %c1_i32_17 = arith.constant 1 : i32
    %36 = tpu.dynamic_rotate %28 by %c1_i32_17 dim 0 : vector<8x8xf32>, i32 -> vector<8x8xf32>
    %cst_18 = arith.constant 0.000000e+00 : f32
    %37 = vector.broadcast %cst_18 : f32 to vector<8x8xf32>
    %38 = arith.select %32, %36, %37 : vector<8x8xi1>, vector<8x8xf32>
    %39 = vector.broadcast %26 : vector<1x8xf32> to vector<8x8xf32>
    %40 = arith.mulf %39, %35 : vector<8x8xf32>
    %41 = arith.addf %25, %40 : vector<8x8xf32>
    %42 = vector.broadcast %27 : vector<1x8xf32> to vector<8x8xf32>
    %43 = arith.mulf %42, %38 : vector<8x8xf32>
    %44 = arith.subf %41, %43 : vector<8x8xf32>
    %45 = vector.broadcast %26 : vector<1x8xf32> to vector<8x8xf32>
    %46 = arith.mulf %45, %38 : vector<8x8xf32>
    %47 = arith.addf %28, %46 : vector<8x8xf32>
    %48 = vector.broadcast %27 : vector<1x8xf32> to vector<8x8xf32>
    %49 = arith.mulf %48, %35 : vector<8x8xf32>
    %50 = arith.addf %47, %49 : vector<8x8xf32>
    %51 = arith.mulf %26, %26 : vector<1x8xf32>
    %52 = arith.mulf %27, %27 : vector<1x8xf32>
    %53 = arith.subf %51, %52 : vector<1x8xf32>
    %cst_19 = arith.constant 2.000000e+00 : f32
    %54 = vector.broadcast %cst_19 : f32 to vector<1x8xf32>
    %55 = arith.mulf %54, %26 : vector<1x8xf32>
    %56 = arith.mulf %55, %27 : vector<1x8xf32>
    %c2_i32 = arith.constant 2 : i32
    %57 = vector.broadcast %c2_i32 : i32 to vector<8x8xi32>
    %58 = arith.cmpi sge, %30, %57 : vector<8x8xi32>
    %c2_i32_20 = arith.constant 2 : i32
    %59 = tpu.dynamic_rotate %44 by %c2_i32_20 dim 0 : vector<8x8xf32>, i32 -> vector<8x8xf32>
    %cst_21 = arith.constant 0.000000e+00 : f32
    %60 = vector.broadcast %cst_21 : f32 to vector<8x8xf32>
    %61 = arith.select %58, %59, %60 : vector<8x8xi1>, vector<8x8xf32>
    %c2_i32_22 = arith.constant 2 : i32
    %62 = tpu.dynamic_rotate %50 by %c2_i32_22 dim 0 : vector<8x8xf32>, i32 -> vector<8x8xf32>
    %cst_23 = arith.constant 0.000000e+00 : f32
    %63 = vector.broadcast %cst_23 : f32 to vector<8x8xf32>
    %64 = arith.select %58, %62, %63 : vector<8x8xi1>, vector<8x8xf32>
    %65 = vector.broadcast %53 : vector<1x8xf32> to vector<8x8xf32>
    %66 = arith.mulf %65, %61 : vector<8x8xf32>
    %67 = arith.addf %44, %66 : vector<8x8xf32>
    %68 = vector.broadcast %56 : vector<1x8xf32> to vector<8x8xf32>
    %69 = arith.mulf %68, %64 : vector<8x8xf32>
    %70 = arith.subf %67, %69 : vector<8x8xf32>
    %71 = vector.broadcast %53 : vector<1x8xf32> to vector<8x8xf32>
    %72 = arith.mulf %71, %64 : vector<8x8xf32>
    %73 = arith.addf %50, %72 : vector<8x8xf32>
    %74 = vector.broadcast %56 : vector<1x8xf32> to vector<8x8xf32>
    %75 = arith.mulf %74, %61 : vector<8x8xf32>
    %76 = arith.addf %73, %75 : vector<8x8xf32>
    %77 = arith.mulf %53, %53 : vector<1x8xf32>
    %78 = arith.mulf %56, %56 : vector<1x8xf32>
    %79 = arith.subf %77, %78 : vector<1x8xf32>
    %cst_24 = arith.constant 2.000000e+00 : f32
    %80 = vector.broadcast %cst_24 : f32 to vector<1x8xf32>
    %81 = arith.mulf %80, %53 : vector<1x8xf32>
    %82 = arith.mulf %81, %56 : vector<1x8xf32>
    %c4_i32 = arith.constant 4 : i32
    %83 = vector.broadcast %c4_i32 : i32 to vector<8x8xi32>
    %84 = arith.cmpi sge, %30, %83 : vector<8x8xi32>
    %c4_i32_25 = arith.constant 4 : i32
    %85 = tpu.dynamic_rotate %70 by %c4_i32_25 dim 0 : vector<8x8xf32>, i32 -> vector<8x8xf32>
    %cst_26 = arith.constant 0.000000e+00 : f32
    %86 = vector.broadcast %cst_26 : f32 to vector<8x8xf32>
    %87 = arith.select %84, %85, %86 : vector<8x8xi1>, vector<8x8xf32>
    %c4_i32_27 = arith.constant 4 : i32
    %88 = tpu.dynamic_rotate %76 by %c4_i32_27 dim 0 : vector<8x8xf32>, i32 -> vector<8x8xf32>
    %cst_28 = arith.constant 0.000000e+00 : f32
    %89 = vector.broadcast %cst_28 : f32 to vector<8x8xf32>
    %90 = arith.select %84, %88, %89 : vector<8x8xi1>, vector<8x8xf32>
    %91 = vector.broadcast %79 : vector<1x8xf32> to vector<8x8xf32>
    %92 = arith.mulf %91, %87 : vector<8x8xf32>
    %93 = arith.addf %70, %92 : vector<8x8xf32>
    %94 = vector.broadcast %82 : vector<1x8xf32> to vector<8x8xf32>
    %95 = arith.mulf %94, %90 : vector<8x8xf32>
    %96 = arith.subf %93, %95 : vector<8x8xf32>
    %97 = vector.broadcast %79 : vector<1x8xf32> to vector<8x8xf32>
    %98 = arith.mulf %97, %90 : vector<8x8xf32>
    %99 = arith.addf %76, %98 : vector<8x8xf32>
    %100 = vector.broadcast %82 : vector<1x8xf32> to vector<8x8xf32>
    %101 = arith.mulf %100, %87 : vector<8x8xf32>
    %102 = arith.addf %99, %101 : vector<8x8xf32>
    %c0_29 = arith.constant 0 : index
    %c0_30 = arith.constant 0 : index
    %103 = vector.load %arg6[%c0_29, %c0_30] : memref<1x8xf32, #tpu.memory_space<vmem>>, vector<1x8xf32>
    %c0_31 = arith.constant 0 : index
    %c0_32 = arith.constant 0 : index
    %104 = vector.load %arg7[%c0_31, %c0_32] : memref<1x8xf32, #tpu.memory_space<vmem>>, vector<1x8xf32>
    %105 = vector.broadcast %103 : vector<1x8xf32> to vector<8x8xf32>
    %106 = arith.mulf %105, %96 : vector<8x8xf32>
    %107 = vector.broadcast %104 : vector<1x8xf32> to vector<8x8xf32>
    %108 = arith.mulf %107, %102 : vector<8x8xf32>
    %109 = arith.subf %106, %108 : vector<8x8xf32>
    %110 = vector.broadcast %103 : vector<1x8xf32> to vector<8x8xf32>
    %111 = arith.mulf %110, %102 : vector<8x8xf32>
    %112 = vector.broadcast %104 : vector<1x8xf32> to vector<8x8xf32>
    %113 = arith.mulf %112, %96 : vector<8x8xf32>
    %114 = arith.addf %111, %113 : vector<8x8xf32>
    %c0_33 = arith.constant 0 : index
    %c0_34 = arith.constant 0 : index
    %c0_35 = arith.constant 0 : index
    %115 = vector.load %arg2[%c0_33, %c0_34, %c0_35] : memref<1x1x8xf32, #tpu.memory_space<vmem>>, vector<1x1x8xf32>
    %c0_36 = arith.constant 0 : index
    %c0_37 = arith.constant 0 : index
    %c0_38 = arith.constant 0 : index
    %116 = vector.load %arg3[%c0_36, %c0_37, %c0_38] : memref<1x1x8xf32, #tpu.memory_space<vmem>>, vector<1x1x8xf32>
    %c0_39 = arith.constant 0 : index
    %c0_40 = arith.constant 0 : index
    %117 = vector.load %arg8[%c0_39, %c0_40] : memref<8x8xbf16, #tpu.memory_space<vmem>>, vector<8x8xbf16>
    %118 = arith.extf %117 : vector<8x8xbf16> to vector<8x8xf32>
    %119 = vector.shape_cast %118 : vector<8x8xf32> to vector<1x8x8xf32>
    %c0_41 = arith.constant 0 : index
    %c0_42 = arith.constant 0 : index
    %120 = vector.load %arg9[%c0_41, %c0_42] : memref<8x8xbf16, #tpu.memory_space<vmem>>, vector<8x8xbf16>
    %121 = arith.extf %120 : vector<8x8xbf16> to vector<8x8xf32>
    %122 = vector.shape_cast %121 : vector<8x8xf32> to vector<1x8x8xf32>
    %123 = vector.broadcast %115 : vector<1x1x8xf32> to vector<1x8x8xf32>
    %124 = arith.mulf %123, %119 : vector<1x8x8xf32>
    %125 = vector.broadcast %116 : vector<1x1x8xf32> to vector<1x8x8xf32>
    %126 = arith.mulf %125, %122 : vector<1x8x8xf32>
    %127 = arith.subf %124, %126 : vector<1x8x8xf32>
    %128 = vector.shape_cast %127 : vector<1x8x8xf32> to vector<8x8xf32>
    %129 = arith.addf %109, %128 : vector<8x8xf32>
    %130 = vector.broadcast %115 : vector<1x1x8xf32> to vector<1x8x8xf32>
    %131 = arith.mulf %130, %122 : vector<1x8x8xf32>
    %132 = vector.broadcast %116 : vector<1x1x8xf32> to vector<1x8x8xf32>
    %133 = arith.mulf %132, %119 : vector<1x8x8xf32>
    %134 = arith.addf %131, %133 : vector<1x8x8xf32>
    %135 = vector.shape_cast %134 : vector<1x8x8xf32> to vector<8x8xf32>
    %136 = arith.addf %114, %135 : vector<8x8xf32>
    %137 = vector.shape_cast %129 : vector<8x8xf32> to vector<1x8x8xf32>
    %138 = arith.truncf %137 : vector<1x8x8xf32> to vector<1x8x8xbf16>
    %c0_43 = arith.constant 0 : index
    %c0_44 = arith.constant 0 : index
    %c0_45 = arith.constant 0 : index
    %139 = vector.load %arg19[%c0_43, %c0_44, %c0_45] : memref<1x8x8xbf16, #tpu.memory_space<vmem>>, vector<1x8x8xbf16>
    tpu.vector_store %arg19[%c0_43, %c0_44, %c0_45], %138 {strides = array<i32>} : memref<1x8x8xbf16, #tpu.memory_space<vmem>>, vector<1x8x8xbf16>,
    %140 = vector.shape_cast %136 : vector<8x8xf32> to vector<1x8x8xf32>
    %141 = arith.truncf %140 : vector<1x8x8xf32> to vector<1x8x8xbf16>
    %c0_46 = arith.constant 0 : index
    %c0_47 = arith.constant 0 : index
    %c0_48 = arith.constant 0 : index
    %142 = vector.load %arg20[%c0_46, %c0_47, %c0_48] : memref<1x8x8xbf16, #tpu.memory_space<vmem>>, vector<1x8x8xbf16>
    tpu.vector_store %arg20[%c0_46, %c0_47, %c0_48], %141 {strides = array<i32>} : memref<1x8x8xbf16, #tpu.memory_space<vmem>>, vector<1x8x8xbf16>,
    %143 = arith.truncf %1 : vector<8x8xf32> to vector<8x8xbf16>
    %c0_49 = arith.constant 0 : index
    %c0_50 = arith.constant 0 : index
    %144 = vector.load %arg12[%c0_49, %c0_50] : memref<8x8xbf16, #tpu.memory_space<vmem>>, vector<8x8xbf16>
    %cst_51 = arith.constant dense<0.000000e+00> : vector<8x8xf32>
    %145 = tpu.matmul %143, %144, %cst_51 {dimension_numbers = #tpu.dot_dimension_numbers<[1], [0], [0], [1], [0, 0, 1, 1], [], []>} : vector<8x8xbf16>, vector<8x8xbf16>, vector<8x8xf32> -> vector<8x8xf32>
    %c0_52 = arith.constant 0 : index
    %c0_53 = arith.constant 0 : index
    %146 = vector.load %arg13[%c0_52, %c0_53] : memref<1x8xf32, #tpu.memory_space<vmem>>, vector<1x8xf32>
    %147 = vector.broadcast %146 : vector<1x8xf32> to vector<8x8xf32>
    %148 = arith.addf %145, %147 : vector<8x8xf32>
    %149 = arith.negf %148 : vector<8x8xf32>
    %150 = math.exp %149 : vector<8x8xf32>
    %cst_54 = arith.constant 1.000000e+00 : f32
    %151 = vector.broadcast %cst_54 : f32 to vector<8x8xf32>
    %152 = arith.addf %151, %150 : vector<8x8xf32>
    %153 = arith.divf %151, %152 : vector<8x8xf32>
    %154 = arith.mulf %148, %153 : vector<8x8xf32>
    %155 = arith.mulf %129, %154 : vector<8x8xf32>
    %156 = arith.addf %155, %1 : vector<8x8xf32>
    %cst_55 = arith.constant dense<0.000000e+00> : vector<8xf32>
    %157 = vector.multi_reduction <add>, %156, %cst_55 [1] : vector<8x8xf32> to vector<8xf32>
    %158 = vector.shape_cast %157 : vector<8xf32> to vector<8x1xf32>
    %cst_56 = arith.constant 8.000000e+00 : f32
    %159 = vector.broadcast %cst_56 : f32 to vector<8x1xf32>
    %160 = arith.divf %158, %159 : vector<8x1xf32>
    %161 = vector.broadcast %160 : vector<8x1xf32> to vector<8x8xf32>
    %162 = arith.subf %156, %161 : vector<8x8xf32>
    %163 = arith.mulf %162, %162 : vector<8x8xf32>
    %cst_57 = arith.constant dense<0.000000e+00> : vector<8xf32>
    %164 = vector.multi_reduction <add>, %163, %cst_57 [1] : vector<8x8xf32> to vector<8xf32>
    %165 = vector.shape_cast %164 : vector<8xf32> to vector<8x1xf32>
    %cst_58 = arith.constant 8.000000e+00 : f32
    %166 = vector.broadcast %cst_58 : f32 to vector<8x1xf32>
    %167 = arith.divf %165, %166 : vector<8x1xf32>
    %168 = vector.broadcast %160 : vector<8x1xf32> to vector<8x8xf32>
    %169 = arith.subf %156, %168 : vector<8x8xf32>
    %cst_59 = arith.constant 9.99999974E-6 : f32
    %170 = vector.broadcast %cst_59 : f32 to vector<8x1xf32>
    %171 = arith.addf %167, %170 : vector<8x1xf32>
    %172 = math.rsqrt %171 : vector<8x1xf32>
    %173 = vector.broadcast %172 : vector<8x1xf32> to vector<8x8xf32>
    %174 = arith.mulf %169, %173 : vector<8x8xf32>
    %175 = vector.broadcast %2 : vector<1x8xf32> to vector<8x8xf32>
    %176 = arith.mulf %174, %175 : vector<8x8xf32>
    %177 = vector.broadcast %3 : vector<1x8xf32> to vector<8x8xf32>
    %178 = arith.addf %176, %177 : vector<8x8xf32>
    %179 = arith.truncf %178 : vector<8x8xf32> to vector<8x8xbf16>
    %cst_60 = arith.constant 0.000000e+00 : f32
    %180 = vector.broadcast %cst_60 : f32 to vector<8x8xf32>
    %c0_61 = arith.constant 0 : index
    %c0_62 = arith.constant 0 : index
    %181 = vector.load %arg14[%c0_61, %c0_62] : memref<8x32xbf16, #tpu.memory_space<vmem>>, vector<8x32xbf16>
    %cst_63 = arith.constant dense<0.000000e+00> : vector<8x32xf32>
    %182 = tpu.matmul %179, %181, %cst_63 {dimension_numbers = #tpu.dot_dimension_numbers<[1], [0], [0], [1], [0, 0, 1, 1], [], []>} : vector<8x8xbf16>, vector<8x32xbf16>, vector<8x32xf32> -> vector<8x32xf32>
    %c0_64 = arith.constant 0 : index
    %c0_65 = arith.constant 0 : index
    %183 = vector.load %arg15[%c0_64, %c0_65] : memref<1x32xf32, #tpu.memory_space<vmem>>, vector<1x32xf32>
    %184 = vector.broadcast %183 : vector<1x32xf32> to vector<8x32xf32>
    %185 = arith.addf %182, %184 : vector<8x32xf32>
    %186 = arith.negf %185 : vector<8x32xf32>
    %187 = math.exp %186 : vector<8x32xf32>
    %cst_66 = arith.constant 1.000000e+00 : f32
    %188 = vector.broadcast %cst_66 : f32 to vector<8x32xf32>
    %189 = arith.addf %188, %187 : vector<8x32xf32>
    %190 = arith.divf %188, %189 : vector<8x32xf32>
    %191 = arith.mulf %185, %190 : vector<8x32xf32>
    %192 = arith.truncf %191 : vector<8x32xf32> to vector<8x32xbf16>
    %c0_67 = arith.constant 0 : index
    %c0_68 = arith.constant 0 : index
    %193 = vector.load %arg16[%c0_67, %c0_68] : memref<32x8xbf16, #tpu.memory_space<vmem>>, vector<32x8xbf16>
    %cst_69 = arith.constant dense<0.000000e+00> : vector<8x8xf32>
    %194 = tpu.matmul %192, %193, %cst_69 {dimension_numbers = #tpu.dot_dimension_numbers<[1], [0], [0], [1], [0, 0, 1, 1], [], []>} : vector<8x32xbf16>, vector<32x8xbf16>, vector<8x8xf32> -> vector<8x8xf32>
    %195 = arith.addf %180, %194 : vector<8x8xf32>
    %c0_70 = arith.constant 0 : index
    %c0_71 = arith.constant 0 : index
    %196 = vector.load %arg17[%c0_70, %c0_71] : memref<1x8xf32, #tpu.memory_space<vmem>>, vector<1x8xf32>
    %197 = vector.broadcast %196 : vector<1x8xf32> to vector<8x8xf32>
    %198 = arith.addf %195, %197 : vector<8x8xf32>
    %199 = arith.addf %198, %156 : vector<8x8xf32>
    %200 = vector.shape_cast %199 : vector<8x8xf32> to vector<1x8x8xf32>
    %c0_72 = arith.constant 0 : index
    %c0_73 = arith.constant 0 : index
    %c0_74 = arith.constant 0 : index
    %201 = vector.load %arg18[%c0_72, %c0_73, %c0_74] : memref<1x8x8xf32, #tpu.memory_space<vmem>>, vector<1x8x8xf32>
    tpu.vector_store %arg18[%c0_72, %c0_73, %c0_74], %200 {strides = array<i32>} : memref<1x8x8xf32, #tpu.memory_space<vmem>>, vector<1x8x8xf32>,
    return
  }
  func.func @transform_0(%arg0: i32) -> (i32, i32, i32) {
    %c0_i32 = arith.constant 0 : i32
    %c0_i32_0 = arith.constant 0 : i32
    %c0_i32_1 = arith.constant 0 : i32
    return %arg0, %c0_i32, %c0_i32_0 : i32, i32, i32
  }
  func.func @transform_1(%arg0: i32) -> (i32, i32, i32) {
    %c0_i32 = arith.constant 0 : i32
    %c0_i32_0 = arith.constant 0 : i32
    %c0_i32_1 = arith.constant 0 : i32
    return %arg0, %c0_i32, %c0_i32_0 : i32, i32, i32
  }
  func.func @transform_2(%arg0: i32) -> (i32, i32, i32) {
    %c0_i32 = arith.constant 0 : i32
    %c0_i32_0 = arith.constant 0 : i32
    %c0_i32_1 = arith.constant 0 : i32
    return %arg0, %c0_i32, %c0_i32_0 : i32, i32, i32
  }
  func.func @transform_3(%arg0: i32) -> (i32, i32) {
    %c0_i32 = arith.constant 0 : i32
    %c0_i32_0 = arith.constant 0 : i32
    %c0_i32_1 = arith.constant 0 : i32
    return %c0_i32, %c0_i32_0 : i32, i32
  }
  func.func @transform_4(%arg0: i32) -> (i32, i32) {
    %c0_i32 = arith.constant 0 : i32
    %c0_i32_0 = arith.constant 0 : i32
    %c0_i32_1 = arith.constant 0 : i32
    return %c0_i32, %c0_i32_0 : i32, i32
  }
  func.func @transform_5(%arg0: i32) -> (i32, i32) {
    %c0_i32 = arith.constant 0 : i32
    %c0_i32_0 = arith.constant 0 : i32
    %c0_i32_1 = arith.constant 0 : i32
    return %c0_i32, %c0_i32_0 : i32, i32
  }
  func.func @transform_6(%arg0: i32) -> (i32, i32) {
    %c0_i32 = arith.constant 0 : i32
    %c0_i32_0 = arith.constant 0 : i32
    %c0_i32_1 = arith.constant 0 : i32
    return %c0_i32, %c0_i32_0 : i32, i32
  }
  func.func @transform_7(%arg0: i32) -> (i32, i32) {
    %c0_i32 = arith.constant 0 : i32
    %c0_i32_0 = arith.constant 0 : i32
    %c0_i32_1 = arith.constant 0 : i32
    return %c0_i32, %c0_i32_0 : i32, i32
  }
  func.func @transform_8(%arg0: i32) -> (i32, i32) {
    %c0_i32 = arith.constant 0 : i32
    %c0_i32_0 = arith.constant 0 : i32
    %c0_i32_1 = arith.constant 0 : i32
    return %c0_i32, %c0_i32_0 : i32, i32
  }
  func.func @transform_9(%arg0: i32) -> (i32, i32) {
    %c0_i32 = arith.constant 0 : i32
    %c0_i32_0 = arith.constant 0 : i32
    %c0_i32_1 = arith.constant 0 : i32
    return %c0_i32, %c0_i32_0 : i32, i32
  }
  func.func @transform_10(%arg0: i32) -> (i32, i32) {
    %c0_i32 = arith.constant 0 : i32
    %c0_i32_0 = arith.constant 0 : i32
    %c0_i32_1 = arith.constant 0 : i32
    return %c0_i32, %c0_i32_0 : i32, i32
  }
  func.func @transform_11(%arg0: i32) -> (i32, i32) {
    %c0_i32 = arith.constant 0 : i32
    %c0_i32_0 = arith.constant 0 : i32
    %c0_i32_1 = arith.constant 0 : i32
    return %c0_i32, %c0_i32_0 : i32, i32
  }
  func.func @transform_12(%arg0: i32) -> (i32, i32) {
    %c0_i32 = arith.constant 0 : i32
    %c0_i32_0 = arith.constant 0 : i32
    %c0_i32_1 = arith.constant 0 : i32
    return %c0_i32, %c0_i32_0 : i32, i32
  }
  func.func @transform_13(%arg0: i32) -> (i32, i32) {
    %c0_i32 = arith.constant 0 : i32
    %c0_i32_0 = arith.constant 0 : i32
    %c0_i32_1 = arith.constant 0 : i32
    return %c0_i32, %c0_i32_0 : i32, i32
  }
  func.func @transform_14(%arg0: i32) -> (i32, i32) {
    %c0_i32 = arith.constant 0 : i32
    %c0_i32_0 = arith.constant 0 : i32
    %c0_i32_1 = arith.constant 0 : i32
    return %c0_i32, %c0_i32_0 : i32, i32
  }
  func.func @transform_15(%arg0: i32) -> (i32, i32) {
    %c0_i32 = arith.constant 0 : i32
    %c0_i32_0 = arith.constant 0 : i32
    %c0_i32_1 = arith.constant 0 : i32
    return %c0_i32, %c0_i32_0 : i32, i32
  }
  func.func @transform_16(%arg0: i32) -> (i32, i32) {
    %c0_i32 = arith.constant 0 : i32
    %c0_i32_0 = arith.constant 0 : i32
    %c0_i32_1 = arith.constant 0 : i32
    return %c0_i32, %c0_i32_0 : i32, i32
  }
  func.func @transform_17(%arg0: i32) -> (i32, i32, i32) {
    %c0_i32 = arith.constant 0 : i32
    %c0_i32_0 = arith.constant 0 : i32
    %c0_i32_1 = arith.constant 0 : i32
    return %arg0, %c0_i32, %c0_i32_0 : i32, i32, i32
  }
  func.func @transform_18(%arg0: i32) -> (i32, i32, i32) {
    %c0_i32 = arith.constant 0 : i32
    %c0_i32_0 = arith.constant 0 : i32
    %c0_i32_1 = arith.constant 0 : i32
    return %arg0, %c0_i32, %c0_i32_0 : i32, i32, i32
  }
  func.func @transform_19(%arg0: i32) -> (i32, i32, i32) {
    %c0_i32 = arith.constant 0 : i32
    %c0_i32_0 = arith.constant 0 : i32
    %c0_i32_1 = arith.constant 0 : i32
    return %arg0, %c0_i32, %c0_i32_0 : i32, i32, i32
  }
}

</mosaic_0001>

<bundles_post_ra>
// kernel: tpu_custom_call.1
= control target key start
LH: loop header
LB: loop body
LE: loop exit
PB: predicated region body
PF: predicated region fallthrough
CT: control target
= control target key end

     0   :  { %s3366_s0 = inlined_call_operand.hbm [shape: f32[2,8,8], index: 0, kind: input, shape index: {}]   ;;  %s3367_s1 = inlined_call_operand.hbm [shape: f32[2,1,8], index: 1, kind: input, shape index: {}]   ;;  %s3368_s2 = inlined_call_operand.hbm [shape: f32[2,1,8], index: 2, kind: input, shape index: {}]   ;;  %s3369_s3 = inlined_call_operand.hbm [shape: f32[1,8], index: 3, kind: input, shape index: {}]   ;;  %s3370_s4 = inlined_call_operand.hbm [shape: f32[1,8], index: 4, kind: input, shape index: {}]   ;;  %s3371_s5 = inlined_call_operand.hbm [shape: f32[1,8], index: 5, kind: input, shape index: {}]   ;;  %s3372_s6 = inlined_call_operand.hbm [shape: f32[1,8], index: 6, kind: input, shape index: {}]   ;;  %s3373_s7 = inlined_call_operand.hbm [shape: bf16[8,8], index: 7, kind: input, shape index: {}]   ;;  %s3374_s8 = inlined_call_operand.hbm [shape: bf16[8,8], index: 8, kind: input, shape index: {}]   ;;  %s3375_s9 = inlined_call_operand.hbm [shape: f32[1,8], index: 9, kind: input, shape index: {}]   ;;  %s3376_s10 = inlined_call_operand.hbm [shape: f32[1,8], index: 10, kind: input, shape index: {}]   ;;  %s3377_s11 = inlined_call_operand.hbm [shape: bf16[8,8], index: 11, kind: input, shape index: {}]   ;;  %s3378_s12 = inlined_call_operand.hbm [shape: f32[1,8], index: 12, kind: input, shape index: {}]   ;;  %s3379_s13 = inlined_call_operand.hbm [shape: bf16[8,32], index: 13, kind: input, shape index: {}]   ;;  %s3380_s14 = inlined_call_operand.hbm [shape: f32[1,32], index: 14, kind: input, shape index: {}]   ;;  %s3381_s15 = inlined_call_operand.hbm [shape: bf16[32,8], index: 15, kind: input, shape index: {}]   ;;  %s3382_s16 = inlined_call_operand.hbm [shape: f32[1,8], index: 16, kind: input, shape index: {}]   ;;  %s3383_s17 = inlined_call_operand.hbm [shape: f32[2,8,8], index: 17, kind: output, shape index: {0}]   ;;  %s3384_s18 = inlined_call_operand.hbm [shape: bf16[2,8,8], index: 18, kind: output, shape index: {1}]   ;;  %s3385_s19 = inlined_call_operand.hbm [shape: bf16[2,8,8], index: 19, kind: output, shape index: {2}]  }
   0x1   :  { %3417 = sst [smem:[#allocation49_spill]] %s3366_s0 }
   0x2   :  { %3418 = sst [smem:[#allocation50_spill]] %s3367_s1 }
   0x3   :  { %3419 = sst [smem:[#allocation51_spill]] %s3368_s2 }
   0x4   :  { %3420 = sst [smem:[#allocation52_spill]] %s3369_s3 }
   0x5   :  { %3421 = sst [smem:[#allocation53_spill]] %s3370_s4 }
   0x6   :  { %3422 = sst [smem:[#allocation54_spill]] %s3371_s5 }
   0x7   :  { %3423 = sst [smem:[#allocation55_spill]] %s3373_s7 }
   0x8   :  { %3424 = sst [smem:[#allocation56_spill]] %s3375_s9 }
   0x9   :  { %3425 = sst [smem:[#allocation57_spill]] %s3377_s11 }
   0xa   :  { %3426 = sst [smem:[#allocation58_spill]] %s3378_s12 }
   0xb   :  { %3427 = sst [smem:[#allocation59_spill]] %s3379_s13 }
   0xc   :  { %3428 = sst [smem:[#allocation60_spill]] %s3380_s14 }
   0xd   :  { %3429 = sst [smem:[#allocation61_spill]] %s3381_s15 }
   0xe   :  { %3430 = sst [smem:[#allocation62_spill]] %s3382_s16 }
   0xf   :  { %3431 = sst [smem:[#allocation63_spill]] %s3383_s17 }
  0x10   :  { %3432 = sst [smem:[#allocation64_spill]] %s3384_s18 }
  0x11   :  { %3433 = sst [smem:[#allocation65_spill]] %s3385_s19 }
  0x12   :  { %25 = vsyncpa [#allocation3], 0 }
  0x13   :  { %27 = vsyncpa [#allocation3 + $0x1], 0 }
  0x14   :  { %28 = vsyncpa [#allocation6], 0 }
  0x15   :  { %30 = vsyncpa [#allocation6 + $0x1], 0 }
  0x16   :  { %31 = vsyncpa [#allocation9], 0 }
  0x17   :  { %32 = vsyncpa [#allocation12], 0 }
  0x18   :  { %33 = vsyncpa [#allocation15], 0 }
  0x19   :  { %34 = vsyncpa [#allocation18], 0 }
  0x1a   :  { %35 = vsyncpa [#allocation21], 0 }
  0x1b   :  { %36 = vsyncpa [#allocation24], 0 }
  0x1c   :  { %37 = vsyncpa [#allocation27], 0 }
  0x1d   :  { %38 = vsyncpa [#allocation4], 0 }
  0x1e   :  { %40 = vsyncpa [#allocation4 + $0x1], 0 }
  0x1f   :  { %41 = vsyncpa [#allocation31], 0 }
  0x20   :  { %43 = vsyncpa [#allocation31 + $0x1], 0  ;;  %s2695_s0 = smov 0   ;;  %s2697_s30 = smov 0  }
  0x21   :  { %s2699_s20 = smov 0   ;;  %s2701_s21 = smov 0  }
  0x22 LB: > { %3434 = sst [smem:[#allocation44_spill]] %s2565_s20  ;;  %s2571_s1 = smov [#allocation8]   ;;  %s2569_s21 = sphi %s2701_s21, %s3492_s21   ;;  %s2565_s20 = sphi %s2699_s20, %s3494_s20   ;;  %s2561_s30 = sphi %s2697_s30, %s3496_s30   ;;  %s2557_s0 = sphi %s2695_s0, %s3495_s0  }
  0x23   : > { %s517_s22 = sshll.u32 %s2571_s1, 4  ;;  %s2716_s2 = sadd.s32 4294967295, %s2569_s21   ;;  %s2721_s22 = int_to_ptr.vmem [resolvable:$true] %s517_s22 }
  0x24   : > { %p1614_p0 = scmp.ge.s32.totalorder %s2569_s21, 1  ;;  %p3397_p1 = scmp.eq.s32.totalorder %s2716_s2, 0 }
  0x25   : > { %p504_p2 = scmp.lt.s32.totalorder %s2569_s21, 3  ;;  %s2572_s24 = smov [#allocation11]  }
  0x26   : > { %s539_s25 = sshll.u32 %s2572_s24, 4  ;;  %s2573_s3 = smov [#allocation14]   ;;  %s2730_s25 = int_to_ptr.vmem [resolvable:$true] %s539_s25 }
  0x27   : > { %p2723_p3 = pnand %p1614_p0, %p504_p2  ;;  %s561_s26 = sshll.u32 %s2573_s3, 4  ;;  %s2738_s26 = int_to_ptr.vmem [resolvable:$true] %s561_s26 }
  0x28   : > { %s2574_s28 = smov [#allocation17]   ;;  %s3438_s19 = sld [smem:[#allocation52_spill]] }
  0x29   : > { %s3435_s23 = scalar_select %p2723_p3, 1, 0 }
  0x2a   : > { %p1772_p5 = pneg %p2723_p3  ;;  %s2740_s29 = sshll.u32 %s2574_s28, 4  ;;  %s584_s29 = int_to_ptr.vmem [resolvable:$true] %s2740_s29 }
  0x2b   : > { %3436 = sst [smem:[#allocation45_spill]] %s3435_s23 }
  0x2c   : > { %p2734_p6 = pnand %p1772_p5, %p3397_p1 }
  0x2e   : > { %s3437_s27 = scalar_select %p2734_p6, 1, 0 }
  0x2f   : > { %s1929_s18 = scalar_lea.hbm %s3438_s19, 16  ;;  %p2750_p8 = pneg %p2734_p6 }
  0x30   : > { %p1930_p7 = scmp.ne.s32.totalorder %s3438_s19, %s1929_s18  ;;  %p1936_p11 = scmp.lt.u32.totalorder %s1929_s18, %s3438_s19 }
  0x31   : > { %s3439_s3 = scalar_select %p2750_p8, 1, 0 }
  0x32   : > { %p1932_p9 = pnand %p2750_p8, %p1930_p7 }
  0x34   : > { %p1933_p10 = pneg %p1932_p9 }
  0x36   : > { %p1938_p12 = pnand %p1936_p11, %p1933_p10 }
  0x38   : > { %1941 = shalt.err (!%p1938_p12)
}
  0x39   : > { %s1942_s17 = scalar_lea.vmem %s2721_s22, 16  ;;  %s1949_s23 = scalar_lea.vmem %s2721_s22, 32 }
  0x3a   : > { %p1943_p13 = scmp.ne.s32.totalorder %s2721_s22, %s1942_s17  ;;  %p1950_p5 = scmp.lt.s32.totalorder %s2721_s22, %s2721_s22 }
  0x3b   : > { %p1951_p7 = scmp.lt.s32.totalorder %s1949_s23, %s1942_s17 }
  0x3c   : > { %p1945_p0 = pnand %p1943_p13, %p2750_p8 }
  0x3d   : > { %p1952_p9 = por %p1951_p7, %p1950_p5 }
  0x3e   : > { %p1946_p2 = pneg %p1945_p0 }
  0x40   : > { %p1953_p4 = pnand %p1952_p9, %p1946_p2 }
  0x42   : > { %1956 = shalt.err (!%p1953_p4)
}
  0x43   : > { %1775 = dma.hbm_to_vmem [thread:$0]  (!%p2734_p6), %s3438_s19, 16, %s2721_s22, [#allocation9]  }
  0x44   : > { %s3440_s5 = sld [smem:[#allocation54_spill]] }
  0x4a   : > { %s1957_s28 = scalar_lea.hbm %s3440_s5, 16 }
  0x4b   : > { %p1958_p10 = scmp.ne.s32.totalorder %s3440_s5, %s1957_s28  ;;  %p1964_p4 = scmp.lt.u32.totalorder %s1957_s28, %s3440_s5 }
  0x4d   : > { %p1960_p11 = pnand %p1958_p10, %p2750_p8 }
  0x4f   : > { %p1961_p12 = pneg %p1960_p11 }
  0x51   : > { %p1966_p13 = pnand %p1964_p4, %p1961_p12 }
  0x53   : > { %1969 = shalt.err (!%p1966_p13)
}
  0x54   : > { %s1970_s22 = scalar_lea.vmem %s2730_s25, 16  ;;  %s1977_s12 = scalar_lea.vmem %s2730_s25, 32 }
  0x55   : > { %p1971_p0 = scmp.ne.s32.totalorder %s2730_s25, %s1970_s22  ;;  %p1978_p7 = scmp.lt.s32.totalorder %s2730_s25, %s2730_s25 }
  0x56   : > { %p1979_p9 = scmp.lt.s32.totalorder %s1977_s12, %s1970_s22 }
  0x57   : > { %p1973_p2 = pnand %p1971_p0, %p2750_p8 }
  0x58   : > { %p1980_p10 = por %p1979_p9, %p1978_p7 }
  0x59   : > { %p1974_p5 = pneg %p1973_p2 }
  0x5b   : > { %p1981_p11 = pnand %p1980_p10, %p1974_p5 }
  0x5d   : > { %1984 = shalt.err (!%p1981_p11)
}
  0x5e   : > { %1781 = dma.hbm_to_vmem [thread:$0]  (!%p2734_p6), %s3440_s5, 16, %s2730_s25, [#allocation12]  }
  0x5f   : > { %s3441_s7 = sld [smem:[#allocation55_spill]] }
  0x65   : > { %s1985_s24 = scalar_lea.hbm %s3441_s7, 64 }
  0x66   : > { %p1986_p12 = scmp.ne.s32.totalorder %s3441_s7, %s1985_s24  ;;  %p1992_p0 = scmp.lt.u32.totalorder %s1985_s24, %s3441_s7 }
  0x68   : > { %p1988_p4 = pnand %p1986_p12, %p2750_p8 }
  0x6a   : > { %p1989_p13 = pneg %p1988_p4 }
  0x6c   : > { %p1994_p2 = pnand %p1992_p0, %p1989_p13 }
  0x6e   : > { %1997 = shalt.err (!%p1994_p2)
}
  0x6f   : > { %s1998_s25 = scalar_lea.vmem %s2738_s26, 64  ;;  %p2006_p10 = scmp.lt.s32.totalorder %s2738_s26, %s2738_s26 }
  0x70   : > { %p1999_p5 = scmp.ne.s32.totalorder %s2738_s26, %s1998_s25  ;;  %p2007_p11 = scmp.lt.s32.totalorder %s1998_s25, %s1998_s25 }
  0x72   : > { %p2001_p7 = pnand %p1999_p5, %p2750_p8  ;;  %p2008_p12 = por %p2007_p11, %p2006_p10 }
  0x74   : > { %p2002_p9 = pneg %p2001_p7 }
  0x76   : > { %p2009_p4 = pnand %p2008_p12, %p2002_p9 }
  0x78   : > { %2012 = shalt.err (!%p2009_p4)
}
  0x79   : > { %1787 = dma.hbm_to_vmem [thread:$0]  (!%p2734_p6), %s3441_s7, 64, %s2738_s26, [#allocation15]  }
  0x7a   : > { %s2575_s16 = smov [#allocation20]   ;;  %s3442_s9 = sld [smem:[#allocation56_spill]] }
  0x7b   : > { %s605_s18 = sshll.u32 %s2575_s16, 4  ;;  %s606_s18 = int_to_ptr.vmem [resolvable:$true] %s605_s18 }
  0x80   : > { %s2013_s28 = scalar_lea.hbm %s3442_s9, 16 }
  0x81   : > { %p2014_p13 = scmp.ne.s32.totalorder %s3442_s9, %s2013_s28  ;;  %p2020_p5 = scmp.lt.u32.totalorder %s2013_s28, %s3442_s9 }
  0x83   : > { %p2016_p0 = pnand %p2014_p13, %p2750_p8 }
  0x85   : > { %p2017_p2 = pneg %p2016_p0 }
  0x87   : > { %p2022_p7 = pnand %p2020_p5, %p2017_p2 }
  0x89   : > { %2025 = shalt.err (!%p2022_p7)
}
  0x8a   : > { %s2026_s26 = scalar_lea.vmem %s584_s29, 16  ;;  %s2033_s12 = scalar_lea.vmem %s584_s29, 32 }
  0x8b   : > { %p2027_p9 = scmp.ne.s32.totalorder %s584_s29, %s2026_s26  ;;  %p2034_p12 = scmp.lt.s32.totalorder %s584_s29, %s584_s29 }
  0x8c   : > { %p2035_p4 = scmp.lt.s32.totalorder %s2033_s12, %s2026_s26 }
  0x8d   : > { %p2029_p10 = pnand %p2027_p9, %p2750_p8 }
  0x8e   : > { %p2036_p1 = por %p2035_p4, %p2034_p12 }
  0x8f   : > { %p2030_p11 = pneg %p2029_p10 }
  0x91   : > { %p2037_p3 = pnand %p2036_p1, %p2030_p11 }
  0x93   : > { %2040 = shalt.err (!%p2037_p3)
}
  0x94   : > { %1793 = dma.hbm_to_vmem [thread:$0]  (!%p2734_p6), %s3442_s9, 16, %s584_s29, [#allocation18]  }
  0x95   : > { %s3443_s11 = sld [smem:[#allocation57_spill]] }
  0x9b   : > { %s2041_s28 = scalar_lea.hbm %s3443_s11, 64 }
  0x9c   : > { %p2042_p13 = scmp.ne.s32.totalorder %s3443_s11, %s2041_s28  ;;  %p2048_p3 = scmp.lt.u32.totalorder %s2041_s28, %s3443_s11 }
  0x9e   : > { %p2044_p0 = pnand %p2042_p13, %p2750_p8 }
  0xa0   : > { %p2045_p1 = pneg %p2044_p0 }
  0xa2   : > { %p2050_p2 = pnand %p2048_p3, %p2045_p1 }
  0xa4   : > { %2053 = shalt.err (!%p2050_p2)
}
  0xa5   : > { %s2054_s26 = scalar_lea.vmem %s606_s18, 64  ;;  %p2062_p10 = scmp.lt.s32.totalorder %s606_s18, %s606_s18 }
  0xa6   : > { %p2055_p5 = scmp.ne.s32.totalorder %s606_s18, %s2054_s26  ;;  %p2063_p11 = scmp.lt.s32.totalorder %s2054_s26, %s2054_s26 }
  0xa8   : > { %p2057_p7 = pnand %p2055_p5, %p2750_p8  ;;  %p2064_p12 = por %p2063_p11, %p2062_p10 }
  0xaa   : > { %p2058_p9 = pneg %p2057_p7 }
  0xac   : > { %p2065_p4 = pnand %p2064_p12, %p2058_p9 }
  0xae   : > { %2068 = shalt.err (!%p2065_p4)
}
  0xaf   : > { %1799 = dma.hbm_to_vmem [thread:$0]  (!%p2734_p6), %s3443_s11, 64, %s606_s18, [#allocation21]  }
  0xb0   : > { %s2576_s14 = smov [#allocation23]   ;;  %s2577_s1 = smov [#allocation26]  }
  0xb1   : > { %s627_s16 = sshll.u32 %s2576_s14, 4  ;;  %s648_s24 = sshll.u32 %s2577_s1, 4  ;;  %s628_s16 = int_to_ptr.vmem [resolvable:$true] %s627_s16  ;;  %s649_s24 = int_to_ptr.vmem [resolvable:$true] %s648_s24 }
  0xb2   : > { %s3444_s13 = sld [smem:[#allocation59_spill]] }
  0xb8   : > { %s2069_s23 = scalar_lea.hbm %s3444_s13, 64 }
  0xb9   : > { %p2070_p13 = scmp.ne.s32.totalorder %s3444_s13, %s2069_s23  ;;  %p2076_p3 = scmp.lt.u32.totalorder %s2069_s23, %s3444_s13 }
  0xbb   : > { %p2072_p0 = pnand %p2070_p13, %p2750_p8 }
  0xbd   : > { %p2073_p1 = pneg %p2072_p0 }
  0xbf   : > { %p2078_p2 = pnand %p2076_p3, %p2073_p1 }
  0xc1   : > { %2081 = shalt.err (!%p2078_p2)
}
  0xc2   : > { %s2082_s18 = scalar_lea.vmem %s628_s16, 64  ;;  %p2090_p10 = scmp.lt.s32.totalorder %s628_s16, %s628_s16 }
  0xc3   : > { %p2083_p5 = scmp.ne.s32.totalorder %s628_s16, %s2082_s18  ;;  %p2091_p11 = scmp.lt.s32.totalorder %s2082_s18, %s2082_s18 }
  0xc5   : > { %p2085_p7 = pnand %p2083_p5, %p2750_p8  ;;  %p2092_p12 = por %p2091_p11, %p2090_p10 }
  0xc7   : > { %p2086_p9 = pneg %p2085_p7 }
  0xc9   : > { %p2093_p4 = pnand %p2092_p12, %p2086_p9 }
  0xcb   : > { %2096 = shalt.err (!%p2093_p4)
}
  0xcc   : > { %1805 = dma.hbm_to_vmem [thread:$0]  (!%p2734_p6), %s3444_s13, 64, %s628_s16, [#allocation24]  }
  0xcd   : > { %s3445_s15 = sld [smem:[#allocation61_spill]] }
  0xd3   : > { %s2097_s17 = scalar_lea.hbm %s3445_s15, 256 }
  0xd4   : > { %p2098_p13 = scmp.ne.s32.totalorder %s3445_s15, %s2097_s17  ;;  %p2104_p3 = scmp.lt.u32.totalorder %s2097_s17, %s3445_s15 }
  0xd6   : > { %p2100_p0 = pnand %p2098_p13, %p2750_p8 }
  0xd8   : > { %p2101_p1 = pneg %p2100_p0 }
  0xda   : > { %p2106_p2 = pnand %p2104_p3, %p2101_p1 }
  0xdc   : > { %2109 = shalt.err (!%p2106_p2)
}
  0xdd   : > { %s2110_s29 = scalar_lea.vmem %s649_s24, 256  ;;  %p2118_p10 = scmp.lt.s32.totalorder %s649_s24, %s649_s24 }
  0xde   : > { %p2111_p5 = scmp.ne.s32.totalorder %s649_s24, %s2110_s29  ;;  %p2119_p11 = scmp.lt.s32.totalorder %s2110_s29, %s2110_s29 }
  0xe0   : > { %p2113_p7 = pnand %p2111_p5, %p2750_p8  ;;  %p2120_p12 = por %p2119_p11, %p2118_p10 }
  0xe2   : > { %p2114_p9 = pneg %p2113_p7 }
  0xe4   : > { %p2121_p4 = pnand %p2120_p12, %p2114_p9 }
  0xe6   : > { %2124 = shalt.err (!%p2121_p4)
}
  0xe7   : > { %s2578_s16 = smov 64   ;;  %s2579_s18 = smov 4  }
  0xe8   : > { %1811 = dma.hbm_to_vmem [thread:$0]  (!%p2734_p6), %s3445_s15, 256, %s649_s24, [#allocation27], %s2578_s16, %s2578_s16, %s2579_s18  }
  0xe9   : > { %s3399_s1 = sadd.s32 4294967294, %s2569_s21   ;;  %s2894_s28 = sadd.s32 1, %s2569_s21  }
  0xea   : > { %3446 = sst [smem:[#allocation46_spill]] %s2894_s28  ;;  %s56_s17 = sadd.s32 1, %s2565_s20 }
  0xeb   : > { %s53_s23 = ssub.s32 %s2569_s21, %s2894_s28  ;;  %p63_p13 = scmp.ne.s32.totalorder %s2565_s20, %s2561_s30 }
  0xec   : > { %p54_p0 = scmp.eq.s32.totalorder %s53_s23, 0  ;;  %p64_p1 = scmp.eq.s32.totalorder %s2569_s21, 0 }
  0xed   : > { %p69_p3 = scmp.ne.s32.totalorder %s2561_s30, %s2557_s0  ;;  %p439_p2 = scmp.eq.s32.totalorder %s2716_s2, 1 }
  0xee   : > { %s2906_s22 = scalar_select %p54_p0, %s2565_s20, %s56_s17  }
  0xef   : > { %p65_p5 = por %p64_p1, %p63_p13  ;;  %p3448_p7 = scmp.eq.s32.totalorder %s2716_s2, 0 }
  0xf0   : > { %3447 = sst [smem:[#allocation47_spill]] %s2906_s22  ;;  %p2914_p10 = por %p439_p2, %p63_p13 }
  0xf1   : > { %p2910_p9 = por %p3448_p7, %p69_p3  ;;  %p445_p11 = scmp.eq.s32.totalorder %s3399_s1, 1 }
  0xf2   : > { %s3450_s25 = scalar_select %p2914_p10, 1, 0 }
  0xf3   : > { %s3449_s24 = scalar_select %p2910_p9, 1, 0 }
  0xf4   : > { %p1849_p12 = scmp.lt.s32.totalorder %s2569_s21, 2  ;;  %s2922_s26 = sand.u32 1, %s2565_s20  }
  0xf5   : > { %p2924_p4 = por %p445_p11, %p69_p3  ;;  %s691_s16 = sand.u32 1, %s2569_s21  }
  0xf6   : > { %p2929_p0 = pnand %p1849_p12, %p65_p5  ;;  %s1632_s12 = sshll.u32 %s2569_s21, 4 }
  0xf7   : > { %s3451_s29 = scalar_select %p2924_p4, 1, 0 }
  0xf8   : > { %s3453_s18 = scalar_select %p2929_p0, 1, 0 }
  0xf9   : > { %3452 = sst [smem:[#allocation48_spill]] %s3451_s29  ;;  %s3454_s23 = sld [smem:[#allocation50_spill]] }
  0xfa   : > { %s694_s1 = scalar_lea.vmem [#allocation5], %s2922_s26  ;;  %s3455_s13 = sld [smem:[#allocation51_spill]] }
  0xfb   : > { %s701_s7 = sshll.u32 %s694_s1, 4  ;;  %s2947_s19 = scalar_lea.sflag [#allocation6], %s691_s16  ;;  %s2945_s7 = int_to_ptr.vmem [resolvable:$true] %s701_s7 }
  0xfc   : > { %p2953_p1 = pneg %p2929_p0 }
  0xfe   : > { %s3456_s14 = scalar_select %p2953_p1, 1, 0 }
  0xff   : > { %s2937_s5 = scalar_lea.hbm %s3454_s23, %s1632_s12  ;;  %s2130_s9 = scalar_lea.hbm %s3454_s23, 32 }
 0x100   : > { %s2943_s15 = scalar_lea.hbm %s3455_s13, %s1632_s12  ;;  %s2125_s22 = scalar_lea.hbm %s2937_s5, 16 }
 0x101   : > { %p2126_p13 = scmp.ne.s32.totalorder %s2937_s5, %s2125_s22  ;;  %p2131_p5 = scmp.lt.u32.totalorder %s2937_s5, %s3454_s23 }
 0x102   : > { %p2132_p7 = scmp.lt.u32.totalorder %s2130_s9, %s2125_s22  ;;  %p2134_p12 = scmp.lt.u32.totalorder %s2125_s22, %s2937_s5 }
 0x103   : > { %p2128_p3 = pnand %p2953_p1, %p2126_p13 }
 0x104   : > { %p2133_p11 = por %p2132_p7, %p2131_p5 }
 0x105   : > { %p2129_p2 = pneg %p2128_p3 }
 0x106   : > { %p2135_p4 = por %p2134_p12, %p2133_p11 }
 0x108   : > { %p2136_p10 = pnand %p2135_p4, %p2129_p2 }
 0x10a   : > { %2139 = shalt.err (!%p2136_p10)
}
 0x10b   : > { %s2140_s16 = scalar_lea.vmem %s2945_s7, 16  ;;  %s2580_s1 = smov [#allocation5]  }
 0x10c   : > { %p2141_p13 = scmp.ne.s32.totalorder %s2945_s7, %s2140_s16  ;;  %s2145_s17 = sshll.u32 %s2580_s1, 4  ;;  %s2146_s17 = int_to_ptr.vmem [resolvable:$false] %s2145_s17 }
 0x10d   : > { %s2147_s11 = scalar_lea.vmem %s2146_s17, 32  ;;  %p2148_p6 = scmp.lt.s32.totalorder %s2945_s7, %s2146_s17 }
 0x10e   : > { %p2143_p3 = pnand %p2141_p13, %p2953_p1  ;;  %p2149_p8 = scmp.lt.s32.totalorder %s2147_s11, %s2140_s16 }
 0x110   : > { %p2144_p9 = pneg %p2143_p3  ;;  %p2150_p5 = por %p2149_p8, %p2148_p6 }
 0x112   : > { %p2151_p7 = pnand %p2150_p5, %p2144_p9 }
 0x114   : > { %2154 = shalt.err (!%p2151_p7)
}
 0x115   : > { %1821 = dma.hbm_to_vmem [thread:$0]  (!%p2929_p0), %s2937_s5, 16, %s2945_s7, %s2947_s19  }
 0x116   : > { %s2581_s22 = smov [#allocation10]   ;;  %s2582_s12 = smov [#allocation13]  }
 0x117   : > { %s528_s9 = sshll.u32 %s2581_s22, 4  ;;  %s550_s23 = sshll.u32 %s2582_s12, 4  ;;  %s529_s9 = int_to_ptr.vmem [resolvable:$true] %s528_s9  ;;  %s551_s23 = int_to_ptr.vmem [resolvable:$true] %s550_s23 }
 0x118   : > { %s3457_s4 = sld [smem:[#allocation53_spill]]  ;;  %p3458_p8 = scmp.ne.s32.totalorder %s3439_s3, 0 }
 0x11e   : > { %s2155_s17 = scalar_lea.hbm %s3457_s4, 16 }
 0x11f   : > { %p2156_p6 = scmp.ne.s32.totalorder %s3457_s4, %s2155_s17  ;;  %p2162_p4 = scmp.lt.u32.totalorder %s2155_s17, %s3457_s4 }
 0x121   : > { %p2158_p9 = pnand %p2156_p6, %p3458_p8 }
 0x123   : > { %p2159_p10 = pneg %p2158_p9 }
 0x125   : > { %p2164_p2 = pnand %p2162_p4, %p2159_p10 }
 0x127   : > { %2167 = shalt.err (!%p2164_p2)
}
 0x128   : > { %s2168_s5 = scalar_lea.vmem %s529_s9, 16  ;;  %s2175_s7 = scalar_lea.vmem %s529_s9, 32 }
 0x129   : > { %p2169_p11 = scmp.ne.s32.totalorder %s529_s9, %s2168_s5  ;;  %p2176_p3 = scmp.lt.s32.totalorder %s529_s9, %s529_s9 }
 0x12a   : > { %p2177_p5 = scmp.lt.s32.totalorder %s2175_s7, %s2168_s5 }
 0x12b   : > { %p2171_p12 = pnand %p2169_p11, %p3458_p8 }
 0x12c   : > { %p2178_p7 = por %p2177_p5, %p2176_p3 }
 0x12d   : > { %p2172_p13 = pneg %p2171_p12 }
 0x12f   : > { %p2179_p0 = pnand %p2178_p7, %p2172_p13 }
 0x131   : > { %2182 = shalt.err (!%p2179_p0)
}
 0x132   : > { %p3459_p6 = scmp.ne.s32.totalorder %s3437_s27, 0  ;;  %s2183_s12 = scalar_lea.hbm %s3372_s6, 16 }
 0x133   : > { %p2184_p9 = scmp.ne.s32.totalorder %s3372_s6, %s2183_s12  ;;  %p2190_p0 = scmp.lt.u32.totalorder %s2183_s12, %s3372_s6 }
 0x134   : > { %1778 = dma.hbm_to_vmem [thread:$0]  (!%p3459_p6), %s3457_s4, 16, %s529_s9, [#allocation9]  }
 0x135   : > { %p2186_p10 = pnand %p2184_p9, %p3458_p8 }
 0x137   : > { %p2187_p4 = pneg %p2186_p10 }
 0x139   : > { %p2192_p2 = pnand %p2190_p0, %p2187_p4 }
 0x13b   : > { %2195 = shalt.err (!%p2192_p2)
}
 0x13c   : > { %s2196_s5 = scalar_lea.vmem %s551_s23, 16  ;;  %s2203_s9 = scalar_lea.vmem %s551_s23, 32 }
 0x13d   : > { %p2197_p11 = scmp.ne.s32.totalorder %s551_s23, %s2196_s5  ;;  %p2204_p3 = scmp.lt.s32.totalorder %s551_s23, %s551_s23 }
 0x13e   : > { %p2205_p5 = scmp.lt.s32.totalorder %s2203_s9, %s2196_s5 }
 0x13f   : > { %p2199_p12 = pnand %p2197_p11, %p3458_p8 }
 0x140   : > { %p2206_p7 = por %p2205_p5, %p2204_p3 }
 0x141   : > { %p2200_p13 = pneg %p2199_p12 }
 0x143   : > { %p2207_p1 = pnand %p2206_p7, %p2200_p13 }
 0x145   : > { %2210 = shalt.err (!%p2207_p1)
}
 0x146   : > { %1784 = dma.hbm_to_vmem [thread:$0]  (!%p3459_p6), %s3372_s6, 16, %s551_s23, [#allocation12]  }
 0x147   : > { %s2583_s22 = smov [#allocation16]   ;;  %s2584_s29 = smov [#allocation19]  }
 0x148   : > { %s572_s28 = sshll.u32 %s2583_s22, 4  ;;  %s594_s12 = sshll.u32 %s2584_s29, 4  ;;  %s573_s28 = int_to_ptr.vmem [resolvable:$true] %s572_s28  ;;  %s595_s12 = int_to_ptr.vmem [resolvable:$true] %s594_s12 }
 0x149   : > { %s2211_s16 = scalar_lea.hbm %s3374_s8, 64 }
 0x14a   : > { %p2212_p1 = scmp.ne.s32.totalorder %s3374_s8, %s2211_s16  ;;  %p2218_p4 = scmp.lt.u32.totalorder %s2211_s16, %s3374_s8 }
 0x14c   : > { %p2214_p9 = pnand %p2212_p1, %p3458_p8 }
 0x14e   : > { %p2215_p10 = pneg %p2214_p9 }
 0x150   : > { %p2220_p0 = pnand %p2218_p4, %p2215_p10 }
 0x152   : > { %2223 = shalt.err (!%p2220_p0)
}
 0x153   : > { %s2224_s23 = scalar_lea.vmem %s573_s28, 64  ;;  %p2232_p13 = scmp.lt.s32.totalorder %s573_s28, %s573_s28 }
 0x154   : > { %p2225_p2 = scmp.ne.s32.totalorder %s573_s28, %s2224_s23  ;;  %p2233_p3 = scmp.lt.s32.totalorder %s2224_s23, %s2224_s23 }
 0x156   : > { %p2227_p11 = pnand %p2225_p2, %p3458_p8  ;;  %p2234_p5 = por %p2233_p3, %p2232_p13 }
 0x158   : > { %p2228_p12 = pneg %p2227_p11 }
 0x15a   : > { %p2235_p7 = pnand %p2234_p5, %p2228_p12 }
 0x15c   : > { %2238 = shalt.err (!%p2235_p7)
}
 0x15d   : > { %1790 = dma.hbm_to_vmem [thread:$0]  (!%p3459_p6), %s3374_s8, 64, %s573_s28, [#allocation15]  }
 0x15e   : > { %s2239_s17 = scalar_lea.hbm %s3376_s10, 16 }
 0x15f   : > { %p2240_p1 = scmp.ne.s32.totalorder %s3376_s10, %s2239_s17  ;;  %p2246_p4 = scmp.lt.u32.totalorder %s2239_s17, %s3376_s10 }
 0x161   : > { %p2242_p9 = pnand %p2240_p1, %p3458_p8 }
 0x163   : > { %p2243_p10 = pneg %p2242_p9 }
 0x165   : > { %p2248_p0 = pnand %p2246_p4, %p2243_p10 }
 0x167   : > { %2251 = shalt.err (!%p2248_p0)
}
 0x168   : > { %s2252_s7 = scalar_lea.vmem %s595_s12, 16  ;;  %s2259_s28 = scalar_lea.vmem %s595_s12, 32 }
 0x169   : > { %p2253_p2 = scmp.ne.s32.totalorder %s595_s12, %s2252_s7  ;;  %p2260_p13 = scmp.lt.s32.totalorder %s595_s12, %s595_s12 }
 0x16a   : > { %p2261_p3 = scmp.lt.s32.totalorder %s2259_s28, %s2252_s7 }
 0x16b   : > { %p2255_p11 = pnand %p2253_p2, %p3458_p8 }
 0x16c   : > { %p2262_p5 = por %p2261_p3, %p2260_p13 }
 0x16d   : > { %p2256_p12 = pneg %p2255_p11 }
 0x16f   : > { %p2263_p7 = pnand %p2262_p5, %p2256_p12 }
 0x171   : > { %2266 = shalt.err (!%p2263_p7)
}
 0x172   : > { %1796 = dma.hbm_to_vmem [thread:$0]  (!%p3459_p6), %s3376_s10, 16, %s595_s12, [#allocation18]  }
 0x173   : > { %s2585_s22 = smov [#allocation22]   ;;  %s2586_s1 = smov [#allocation25]  }
 0x174   : > { %s616_s29 = sshll.u32 %s2585_s22, 4  ;;  %s638_s17 = sshll.u32 %s2586_s1, 4  ;;  %s617_s29 = int_to_ptr.vmem [resolvable:$true] %s616_s29  ;;  %s639_s17 = int_to_ptr.vmem [resolvable:$true] %s638_s17 }
 0x175   : > { %s3460_s5 = sld [smem:[#allocation58_spill]] }
 0x17b   : > { %s2267_s9 = scalar_lea.hbm %s3460_s5, 16 }
 0x17c   : > { %p2268_p1 = scmp.ne.s32.totalorder %s3460_s5, %s2267_s9  ;;  %p2274_p4 = scmp.lt.u32.totalorder %s2267_s9, %s3460_s5 }
 0x17e   : > { %p2270_p9 = pnand %p2268_p1, %p3458_p8 }
 0x180   : > { %p2271_p10 = pneg %p2270_p9 }
 0x182   : > { %p2276_p0 = pnand %p2274_p4, %p2271_p10 }
 0x184   : > { %2279 = shalt.err (!%p2276_p0)
}
 0x185   : > { %s2280_s12 = scalar_lea.vmem %s617_s29, 16  ;;  %s2287_s20 = scalar_lea.vmem %s617_s29, 32 }
 0x186   : > { %p2281_p2 = scmp.ne.s32.totalorder %s617_s29, %s2280_s12  ;;  %p2288_p13 = scmp.lt.s32.totalorder %s617_s29, %s617_s29 }
 0x187   : > { %p2289_p3 = scmp.lt.s32.totalorder %s2287_s20, %s2280_s12 }
 0x188   : > { %p2283_p11 = pnand %p2281_p2, %p3458_p8 }
 0x189   : > { %p2290_p5 = por %p2289_p3, %p2288_p13 }
 0x18a   : > { %p2284_p12 = pneg %p2283_p11 }
 0x18c   : > { %p2291_p7 = pnand %p2290_p5, %p2284_p12 }
 0x18e   : > { %2294 = shalt.err (!%p2291_p7)
}
 0x18f   : > { %1802 = dma.hbm_to_vmem [thread:$0]  (!%p3459_p6), %s3460_s5, 16, %s617_s29, [#allocation21]  }
 0x190   : > { %s3461_s11 = sld [smem:[#allocation60_spill]] }
 0x196   : > { %s2295_s9 = scalar_lea.hbm %s3461_s11, 16 }
 0x197   : > { %p2296_p1 = scmp.ne.s32.totalorder %s3461_s11, %s2295_s9  ;;  %p2302_p4 = scmp.lt.u32.totalorder %s2295_s9, %s3461_s11 }
 0x199   : > { %p2298_p9 = pnand %p2296_p1, %p3458_p8 }
 0x19b   : > { %p2299_p10 = pneg %p2298_p9 }
 0x19d   : > { %p2304_p0 = pnand %p2302_p4, %p2299_p10 }
 0x19f   : > { %2307 = shalt.err (!%p2304_p0)
}
 0x1a0   : > { %s2308_s20 = scalar_lea.vmem %s639_s17, 16  ;;  %s2315_s29 = scalar_lea.vmem %s639_s17, 32 }
 0x1a1   : > { %p2309_p2 = scmp.ne.s32.totalorder %s639_s17, %s2308_s20  ;;  %p2316_p13 = scmp.lt.s32.totalorder %s639_s17, %s639_s17 }
 0x1a2   : > { %p2317_p3 = scmp.lt.s32.totalorder %s2315_s29, %s2308_s20 }
 0x1a3   : > { %p2311_p11 = pnand %p2309_p2, %p3458_p8 }
 0x1a4   : > { %p2318_p5 = por %p2317_p3, %p2316_p13 }
 0x1a5   : > { %p2312_p12 = pneg %p2311_p11 }
 0x1a7   : > { %p2319_p7 = pnand %p2318_p5, %p2312_p12 }
 0x1a9   : > { %2322 = shalt.err (!%p2319_p7)
}
 0x1aa   : > { %1808 = dma.hbm_to_vmem [thread:$0]  (!%p3459_p6), %s3461_s11, 16, %s639_s17, [#allocation24]  }
 0x1ab   : > { %s2587_s4 = smov [#allocation28]   ;;  %s1630_s9 = sshll.u32 %s2922_s26, 3 }
 0x1ac   : > { %s662_s16 = sshll.u32 %s2587_s4, 4  ;;  %s3462_s23 = sld [smem:[#allocation62_spill]]  ;;  %s663_s16 = int_to_ptr.vmem [resolvable:$true] %s662_s16 }
 0x1b2   : > { %s2323_s12 = scalar_lea.hbm %s3462_s23, 16 }
 0x1b3   : > { %p2324_p1 = scmp.ne.s32.totalorder %s3462_s23, %s2323_s12  ;;  %p2330_p4 = scmp.lt.u32.totalorder %s2323_s12, %s3462_s23 }
 0x1b5   : > { %p2326_p9 = pnand %p2324_p1, %p3458_p8 }
 0x1b7   : > { %p2327_p10 = pneg %p2326_p9 }
 0x1b9   : > { %p2332_p0 = pnand %p2330_p4, %p2327_p10 }
 0x1bb   : > { %2335 = shalt.err (!%p2332_p0)
}
 0x1bc   : > { %s2336_s17 = scalar_lea.vmem %s663_s16, 16  ;;  %s2343_s1 = scalar_lea.vmem %s663_s16, 32 }
 0x1bd   : > { %p2337_p2 = scmp.ne.s32.totalorder %s663_s16, %s2336_s17  ;;  %p2344_p13 = scmp.lt.s32.totalorder %s663_s16, %s663_s16 }
 0x1be   : > { %p2345_p3 = scmp.lt.s32.totalorder %s2343_s1, %s2336_s17 }
 0x1bf   : > { %p2339_p11 = pnand %p2337_p2, %p3458_p8 }
 0x1c0   : > { %p2346_p5 = por %p2345_p3, %p2344_p13 }
 0x1c1   : > { %p2340_p12 = pneg %p2339_p11 }
 0x1c3   : > { %p2347_p7 = pnand %p2346_p5, %p2340_p12 }
 0x1c5   : > { %2350 = shalt.err (!%p2347_p7)
}
 0x1c6   : > { %1814 = dma.hbm_to_vmem [thread:$0]  (!%p3459_p6), %s3462_s23, 16, %s663_s16, [#allocation27]  }
 0x1c7   : > { %s1631_s5 = sshll.u32 %s2569_s21, 7  ;;  %s3463_s12 = sld [smem:[#allocation49_spill]] }
 0x1c8   : > { %s677_s29 = scalar_lea.vmem [#allocation2], %s1630_s9  ;;  %s674_s27 = scalar_lea.sflag [#allocation3], %s2922_s26 }
 0x1c9   : > { %s684_s22 = sshll.u32 %s677_s29, 4  ;;  %p3464_p1 = scmp.ne.s32.totalorder %s3456_s14, 0  ;;  %s685_s22 = int_to_ptr.vmem [resolvable:$true] %s684_s22 }
 0x1cd   : > { %s3108_s20 = scalar_lea.hbm %s3463_s12, %s1631_s5  ;;  %s2356_s4 = scalar_lea.hbm %s3463_s12, 256 }
 0x1ce   : > { %s2351_s17 = scalar_lea.hbm %s3108_s20, 128  ;;  %p2357_p6 = scmp.lt.u32.totalorder %s3108_s20, %s3463_s12 }
 0x1cf   : > { %p2352_p8 = scmp.ne.s32.totalorder %s3108_s20, %s2351_s17  ;;  %p2358_p4 = scmp.lt.u32.totalorder %s2356_s4, %s2351_s17 }
 0x1d0   : > { %p2360_p2 = scmp.lt.u32.totalorder %s2351_s17, %s3108_s20 }
 0x1d1   : > { %p2354_p9 = pnand %p2352_p8, %p3464_p1  ;;  %p2359_p0 = por %p2358_p4, %p2357_p6 }
 0x1d3   : > { %p2355_p10 = pneg %p2354_p9  ;;  %p2361_p11 = por %p2360_p2, %p2359_p0 }
 0x1d5   : > { %p2362_p12 = pnand %p2361_p11, %p2355_p10 }
 0x1d7   : > { %2365 = shalt.err (!%p2362_p12)
}
 0x1d8   : > { %s2366_s9 = scalar_lea.vmem %s685_s22, 128  ;;  %s2588_s28 = smov [#allocation2]  }
 0x1d9   : > { %p2367_p13 = scmp.ne.s32.totalorder %s685_s22, %s2366_s9  ;;  %s2371_s3 = sshll.u32 %s2588_s28, 4  ;;  %s2372_s3 = int_to_ptr.vmem [resolvable:$false] %s2371_s3 }
 0x1da   : > { %s2373_s29 = scalar_lea.vmem %s2372_s3, 256  ;;  %p2374_p7 = scmp.lt.s32.totalorder %s685_s22, %s2372_s3 }
 0x1db   : > { %p2369_p3 = pnand %p2367_p13, %p3464_p1  ;;  %p2375_p8 = scmp.lt.s32.totalorder %s2373_s29, %s2366_s9 }
 0x1dd   : > { %p2370_p5 = pneg %p2369_p3  ;;  %p2376_p9 = por %p2375_p8, %p2374_p7 }
 0x1df   : > { %p2377_p4 = pnand %p2376_p9, %p2370_p5 }
 0x1e1   : > { %2380 = shalt.err (!%p2377_p4)
}
 0x1e2   : > { %p3465_p6 = scmp.ne.s32.totalorder %s3453_s18, 0  ;;  %s711_s17 = scalar_lea.vmem [#allocation7], %s2922_s26 }
 0x1e3   : > { %s718_s16 = sshll.u32 %s711_s17, 4  ;;  %s2381_s1 = scalar_lea.hbm %s2943_s15, 16  ;;  %s719_s16 = int_to_ptr.vmem [resolvable:$true] %s718_s16 }
 0x1e4   : > { %1818 = dma.hbm_to_vmem [thread:$0]  (!%p3465_p6), %s3108_s20, 128, %s685_s22, %s674_s27  }
 0x1e5   : > { %p2382_p10 = scmp.ne.s32.totalorder %s2943_s15, %s2381_s1  ;;  %s2386_s5 = scalar_lea.hbm %s3455_s13, 32 }
 0x1e6   : > { %p2387_p11 = scmp.lt.u32.totalorder %s2943_s15, %s3455_s13  ;;  %p2388_p12 = scmp.lt.u32.totalorder %s2386_s5, %s2381_s1 }
 0x1e7   : > { %p2384_p0 = pnand %p2382_p10, %p3464_p1  ;;  %p2390_p3 = scmp.lt.u32.totalorder %s2381_s1, %s2943_s15 }
 0x1e8   : > { %p2389_p13 = por %p2388_p12, %p2387_p11 }
 0x1e9   : > { %p2385_p2 = pneg %p2384_p0 }
 0x1ea   : > { %p2391_p5 = por %p2390_p3, %p2389_p13 }
 0x1ec   : > { %p2392_p7 = pnand %p2391_p5, %p2385_p2 }
 0x1ee   : > { %2395 = shalt.err (!%p2392_p7)
}
 0x1ef   : > { %s2396_s26 = scalar_lea.vmem %s719_s16, 16  ;;  %s2589_s20 = smov [#allocation7]  }
 0x1f0   : > { %p2397_p8 = scmp.ne.s32.totalorder %s719_s16, %s2396_s26  ;;  %s2401_s22 = sshll.u32 %s2589_s20, 4  ;;  %s2402_s22 = int_to_ptr.vmem [resolvable:$false] %s2401_s22 }
 0x1f1   : > { %s2403_s27 = scalar_lea.vmem %s2402_s22, 32  ;;  %p2404_p10 = scmp.lt.s32.totalorder %s719_s16, %s2402_s22 }
 0x1f2   : > { %p2399_p9 = pnand %p2397_p8, %p3464_p1  ;;  %p2405_p0 = scmp.lt.s32.totalorder %s2403_s27, %s2396_s26 }
 0x1f4   : > { %p2400_p4 = pneg %p2399_p9  ;;  %p2406_p6 = por %p2405_p0, %p2404_p10 }
 0x1f6   : > { %p2407_p11 = pnand %p2406_p6, %p2400_p4 }
 0x1f8   : > { %2410 = shalt.err (!%p2407_p11)
}
 0x1f9   : > { %p3466_p12 = scmp.ne.s32.totalorder %s3453_s18, 0  ;;  %s3467_s3 = sld [smem:[#allocation45_spill]] }
 0x1fb   : > { %1824 = dma.hbm_to_vmem [thread:$0]  (!%p3466_p12), %s2943_s15, 16, %s719_s16, %s2947_s19  }
 0x1ff   : > { %p3468_p2 = scmp.ne.s32.totalorder %s3467_s3, 0 }
 0x200   : > { %s3150_s14 = sand.u32 (!%p3468_p2), 1, %s2561_s30   ;;  %p3469_p1 = scmp.ne.s32.totalorder (!%p3468_p2), %s3449_s24, 0 }
 0x201   : > { %727 = sbr.rel (%p3468_p2) target bundleno = 1687 (0x697), region = 88  ;;  %s1635_s29 = sshll.u32 (!%p3468_p2), %s3150_s14, 3 }
 0x202   : > { %s730_s17 = scalar_lea.sflag (!%p3468_p2), [#allocation3], %s3150_s14  ;;  %s3156_s1 = scalar_lea.vmem (!%p3468_p2), [#allocation2], %s1635_s29 }
 0x208   : > { %2512 = dma.done.wait (%p3469_p1), %s730_s17, 128  }
 0x209   : > { %2514 = vsyncadd (%p3469_p1), %s730_s17, 4294967168  ;;  %s738_s15 = sand.u32 1, %s2716_s2   ;;  %s741_s18 = scalar_lea.vmem [#allocation5], %s3150_s14 }
 0x20a   : > { %s739_s19 = scalar_lea.sflag [#allocation6], %s738_s15 }
 0x20b   : > { %2516 = dma.done.wait (%p3469_p1), %s739_s19, 32  }
 0x20c   : > { %2518 = vsyncadd (%p3469_p1), %s739_s19, 4294967264  ;;  %s749_s16 = scalar_lea.vmem [#allocation7], %s3150_s14  ;;  %p3470_p6 = scmp.eq.s32.totalorder %s2716_s2, 0 }
 0x20e   : > { %2520 = dma.done.wait (%p3470_p6), [#allocation9], 32   ;;  %p3471_p13 = pmov %p3470_p6 }
 0x20f   : > { %p3472_p3 = pmov %p3470_p6 }
 0x210   : > { %2522 = vsyncadd (%p3471_p13), [#allocation9], 4294967264 }
 0x211   : > { %2524 = dma.done.wait (%p3472_p3), [#allocation12], 32   ;;  %p3473_p5 = pmov %p3472_p3 }
 0x212   : > { %p3474_p7 = pmov %p3472_p3 }
 0x213   : > { %2526 = vsyncadd (%p3473_p5), [#allocation12], 4294967264 }
 0x214   : > { %2528 = dma.done.wait (%p3474_p7), [#allocation15], 128   ;;  %p3475_p8 = pmov %p3472_p3 }
 0x215   : > { %p3476_p9 = pmov %p3472_p3 }
 0x216   : > { %2530 = vsyncadd (%p3475_p8), [#allocation15], 4294967168 }
 0x217   : > { %2532 = dma.done.wait (%p3476_p9), [#allocation18], 32   ;;  %p3477_p4 = pmov %p3472_p3 }
 0x218   : > { %p3478_p10 = pmov %p3472_p3 }
 0x219   : > { %2534 = vsyncadd (%p3477_p4), [#allocation18], 4294967264 }
 0x21a   : > { %2536 = dma.done.wait (%p3478_p10), [#allocation21], 80   ;;  %p3479_p0 = pmov %p3472_p3 }
 0x21c   : > { %2538 = vsyncadd (%p3479_p0), [#allocation21], 4294967216  ;;  %p3480_p11 = pmov %p3479_p0 }
 0x21d   : > { %p3481_p12 = pmov %p3479_p0 }
 0x21e   : > { %2540 = dma.done.wait (%p3480_p11), [#allocation24], 80  }
 0x21f   : > { %2542 = vsyncadd (%p3481_p12), [#allocation24], 4294967216  ;;  %p3482_p2 = pmov %p3479_p0 }
 0x220   : > { %p3483_p1 = pmov %p3479_p0 }
 0x221   : > { %2544 = dma.done.wait (%p3482_p2), [#allocation27], 272  }
 0x222   : > { %2546 = vsyncadd (%p3483_p1), [#allocation27], 4294967024  ;;  %v2590_v0 = vmov 0.0   ;;  %vm2591_vm0 = vmmov 0   ;;  %vm882_vm1 = vcmask 64512   ;;  %vm1062_vm2 = vcmask 1043456  }
 0x223   : > { %1684 = vmatprep.subr.bf16.mxu0 %v2590_v0  ;;  %1686 = vmatprep.mubr.msk.bf16.mxu0 %vm2591_vm0, %v2590_v0  ;;  %v3204_v1 = vld [vmem:[%s3156_s1] sm:$0xff]  ;;  %v913_v18 = vlaneseq  ;;  %v911_v25 = vld [vmem:[#allocation8] sm:$0x1]  ;;  %v912_v28 = vld [vmem:[#allocation10] sm:$0x1]  ;;  %s1651_s24 = sshll.u32 %s3150_s14, 2 }
 0x224   : > { %1690 = vmatprep.subr.bf16.mxu1 %v2590_v0  ;;  %1692 = vmatprep.mubr.msk.bf16.mxu1 %vm2591_vm0, %v2590_v0  ;;  %v1051_v2 = vld [vmem:[#allocation20] sm:$0xf]  ;;  %v883_v3 = vsel %vm882_vm1, %v3204_v1, 0.0  ;;  %v1050_v5 = vpack.c.bf16 %v3204_v1, %v3204_v1  ;;  %v1659_v20 = vld [vmem:[#allocation22] ss:$0 sm:$0xff]  ;;  %v939_v32 = vmul.f32 %v911_v25, %v911_v25  ;;  %v940_v33 = vmul.f32 %v912_v28, %v912_v28  ;;  %s3240_s4 = scalar_lea.vmem [#allocation30], %s1651_s24 }
 0x225   : > { %v1064_v4 = vsel %vm1062_vm2, %v1051_v2, 0  ;;  %884 = vadd.xlane.f32.xlu0 %v883_v3  ;;  %v3216_v19 = vshrl.u32 %v913_v18, 7  ;;  %v3220_v23 = vld [vmem:[#allocation17] ss:$0 sm:$0xff]  ;;  %v3223_v27 = vld [vmem:[#allocation19] ss:$0 sm:$0xff] }
 0x226   : > { %1685 = vmatpush3.bf16.msra.mxu0 %v1064_v4  ;;  %v942_v38 = vmul.f32 2.0, %v911_v25  ;;  %v941_v40 = vsub.f32 %v939_v32, %v940_v33  ;;  %v1658_v18 = vld [vmem:[%s749_s16] ss:$0 sm:$0xff]  ;;  %vm1046_vm6 = vcmask 60416   ;;  %s3243_s7 = scalar_lea.vmem [#allocation32], %s1651_s24  ;;  %vm1216_vm7 = vcmask 261120  }
 0x227   : > { %1696 = vmatprep.subr.bf16.mxu0 %v2590_v0  ;;  %v922_v24 = vsub.s32 0, %v3216_v19  ;;  %vm915_vm3 = vcmp.ge.s32.totalorder %v3216_v19, 1  ;;  %vm944_vm4 = vcmp.ge.s32.totalorder %v3216_v19, 2  ;;  %vm974_vm5 = vcmp.ge.s32.totalorder %v3216_v19, 4  ;;  %s1673_s5 = sshll.u32 %s2716_s2, 6  ;;  %s3484_s26 = sld [smem:[#allocation64_spill]] }
 0x228   : > { %v943_v46 = vmul.f32 %v942_v38, %v912_v28  ;;  %v969_v50 = vmul.f32 %v941_v40, %v941_v40  ;;  %v972_v59 = vmul.f32 2.0, %v941_v40  ;;  %s1299_s22 = sshll.u32 %s3240_s4, 4  ;;  %s3266_s27 = scalar_lea.sflag [#allocation31], %s738_s15  ;;  %s1300_s22 = int_to_ptr.vmem [resolvable:$true] %s1299_s22 }
 0x229   : > { %1687 = vmatmul.mubr.msk.bf16.vlgmr.msra.gmra.mrb[0].mxu0 %vm882_vm1, %v1050_v5  ;;  %v923_v31 = vrot.slane %v911_v25, %v922_v24  ;;  %v931_v35 = vrot.slane %v912_v28, %v922_v24  ;;  %v953_v47 = vrot.slane %v941_v40, %v922_v24  ;;  %v1021_v5 = vld [vmem:[#allocation14] sm:$0xf]  ;;  %s2411_s3 = scalar_lea.vmem %s1300_s22, 64  ;;  %p3485_p13 = scmp.ne.s32.totalorder %s3450_s25, 0 }
 0x22a   : > { %1700 = vmatprep.mubr.msk.bf16.mxu0 %vm2591_vm0, %v2590_v0  ;;  %v970_v51 = vmul.f32 %v943_v46, %v943_v46  ;;  %v961_v54 = vrot.slane %v943_v46, %v922_v24  ;;  %p2412_p6 = scmp.ne.s32.totalorder %s1300_s22, %s2411_s3  ;;  %s2592_s17 = smov [#allocation30]  }
 0x22b   : > { %v935_v37 = vmul.f32 0.0, %v923_v31  ;;  %v933_v41 = vmul.f32 0.0, %v931_v35  ;;  %s2415_s1 = sshll.u32 %s2592_s17, 4  ;;  %s2416_s1 = int_to_ptr.vmem [resolvable:$false] %s2415_s1 }
 0x22c   : > { %v971_v58 = vsub.f32 %v969_v50, %v970_v51  ;;  %p2413_p3 = pnand %p2412_p6, %p3485_p13  ;;  %s2417_s19 = scalar_lea.vmem %s2416_s1, 128 }
 0x22d   : > { %s3261_s20 = scalar_lea.hbm %s3484_s26, %s1673_s5  ;;  %p2418_p7 = scmp.lt.s32.totalorder %s1300_s22, %s2416_s1 }
 0x22e   : > { %p2414_p5 = pneg %p2413_p3  ;;  %p2419_p8 = scmp.lt.s32.totalorder %s2417_s19, %s2411_s3 }
 0x230   : > { %p2420_p9 = por %p2419_p8, %p2418_p7 }
 0x232   : > { %p2421_p4 = pnand %p2420_p9, %p2414_p5 }
 0x2b2   : > { %v885_v6 = vpop.xlane.xlu0 %884 }
 0x2b3   : > { %v887_v7 = vmul.f32 0.125, %v885_v6  ;;  %v973_v6 = vmul.f32 %v972_v59, %v943_v46 }
 0x2b5   : > { %v888_v8 = vsub.f32 %v3204_v1, %v887_v7  ;;  %v983_v7 = vrot.slane %v971_v58, %v922_v24 }
 0x2b7   : > { %v889_v9 = vmul.f32 %v888_v8, %v888_v8 }
 0x2b9   : > { %v890_v10 = vsel %vm882_vm1, %v889_v9, 0.0 }
 0x2ba   : > { %891 = vadd.xlane.f32.xlu0 %v890_v10 }
 0x2fc   : > { %v1100_v11 = vpop.f32.mrb[0].mxu0 }
 0x2fd   : > { %v1688_v12 = vpop.f32.mrb[1].mxu0  ;;  %v3218_v22 = vadd.f32 %v1659_v20, %v1100_v11  ;;  %v1022_v11 = vunpack.c.l.bf16 %v1021_v5  ;;  %v1916_v5 = vld [vmem:[#allocation26 + $0x8] sm:$0xff]  }
 0x2fe   : > { %v1103_v13 = vpop.f32.mrb[2].mxu0 }
 0x2ff   : > { %v1689_v14 = vpop.f32.mrb[3].mxu0  ;;  %v1661_v30 = vmul.f32 -1.442695, %v3218_v22 }
 0x347   : > { %v892_v15 = vpop.xlane.xlu0 %891 }
 0x348   : > { %v893_v16 = vmul.f32 0.125, %v892_v15  ;;  %v991_v15 = vrot.slane %v973_v6, %v922_v24  ;;  %v1662_v6 = vld [vmem:[#allocation25] ss:$0 sm:$0xff] }
 0x34a   : > { %v894_v17 = vadd.f32 1e-05, %v893_v16 }
 0x34c   : > { %1917 = vrsqrt.f32 %v894_v17  ;;  %v1657_v17 = vld [vmem:[%s741_s18] ss:$0 sm:$0xff] }
 0x34d   : > { %1919 = vpow2.f32 %v1661_v30  ;;  %v1031_v19 = vmul.f32 %v1657_v17, %v1022_v11  ;;  %v1042_v30 = vmul.f32 %v1658_v18, %v1022_v11 }
 0x356   : > { %v1918_v21 = vpop.eup %1917 }
 0x357   : > { %v896_v26 = vmul.f32 %v1918_v21, %v888_v8  ;;  %v1920_v56 = vpop.eup %1919  ;;  %v1023_v8 = vld [vmem:[#allocation16] sm:$0xf] }
 0x358   : > { %v1109_v63 = vadd.f32 1.0, %v1920_v56  ;;  %v1024_v14 = vunpack.c.l.bf16 %v1023_v8  ;;  %v1131_v56 = vld [vmem:[#allocation23] sm:$0xf] }
 0x359   : > { %v903_v29 = vmul.f32 %v3220_v23, %v896_v26 }
 0x35a   : > { %1921 = vrcp.f32 %v1109_v63  ;;  %v1038_v28 = vmul.f32 %v1658_v18, %v1024_v14 }
 0x35b   : > { %v910_v34 = vadd.f32 %v3223_v27, %v903_v29  ;;  %v1041_v29 = vmul.f32 %v1657_v17, %v1024_v14 }
 0x35d   : > { %v916_v36 = vrot.slane %v910_v34, 7 }
 0x35f   : > { %v917_v39 = vsel %vm915_vm3, %v916_v36, 0.0  ;;  %v1039_v36 = vsub.f32 %v1031_v19, %v1038_v28 }
 0x360   : > { %v925_v42 = vmul.f32 %v923_v31, %v917_v39  ;;  %v937_v43 = vmul.f32 %v931_v35, %v917_v39  ;;  %v1656_v35 = vld [vmem:[#allocation13] ss:$0 sm:$0xff] }
 0x362   : > { %v926_v44 = vadd.f32 %v925_v42, %v910_v34  ;;  %v938_v45 = vadd.f32 %v937_v43, %v935_v37  ;;  %v1655_v34 = vld [vmem:[#allocation11] ss:$0 sm:$0xff]  ;;  %v1043_v37 = vadd.f32 %v1042_v30, %v1041_v29 }
 0x364   : > { %v934_v48 = vsub.f32 %v926_v44, %v933_v41  ;;  %v947_v49 = vrot.slane %v938_v45, 6  ;;  %v1922_v42 = vpop.eup %1921 }
 0x366   : > { %v945_v52 = vrot.slane %v934_v48, 6  ;;  %v948_v53 = vsel %vm944_vm4, %v947_v49, 0.0 }
 0x367   : > { %v965_v55 = vmul.f32 %v953_v47, %v948_v53  ;;  %v963_v3 = vmul.f32 %v961_v54, %v948_v53 }
 0x368   : > { %v946_v57 = vsel %vm944_vm4, %v945_v52, 0.0 }
 0x369   : > { %v955_v60 = vmul.f32 %v953_v47, %v946_v57  ;;  %v966_v61 = vadd.f32 %v965_v55, %v938_v45  ;;  %v967_v62 = vmul.f32 %v961_v54, %v946_v57  ;;  %v1112_v45 = vmul.f32 %v1922_v42, %v3218_v22 }
 0x36a   : > { %v1143_v57 = vsel %vm1062_vm2, %v1131_v56, 0 }
 0x36b   : > { %v956_v2 = vadd.f32 %v955_v60, %v934_v48  ;;  %v968_v4 = vadd.f32 %v967_v62, %v966_v61  ;;  %1691 = vmatpush3.bf16.msra.mxu1 %v1143_v57 }
 0x36d   : > { %v964_v9 = vsub.f32 %v956_v2, %v963_v3  ;;  %v977_v10 = vrot.slane %v968_v4, 4 }
 0x36f   : > { %v975_v12 = vrot.slane %v964_v9, 4  ;;  %v978_v13 = vsel %vm974_vm5, %v977_v10, 0.0 }
 0x370   : > { %v995_v16 = vmul.f32 %v983_v7, %v978_v13  ;;  %v993_v32 = vmul.f32 %v991_v15, %v978_v13 }
 0x371   : > { %v976_v20 = vsel %vm974_vm5, %v975_v12, 0.0 }
 0x372   : > { %v985_v21 = vmul.f32 %v983_v7, %v976_v20  ;;  %v996_v25 = vadd.f32 %v995_v16, %v968_v4  ;;  %v997_v26 = vmul.f32 %v991_v15, %v976_v20  ;;  %v1915_v4 = vld [vmem:[#allocation26] sm:$0xff]  }
 0x373   : > { %1697 = vmatpush3.bf16.msra.mxu0 %v1915_v4 }
 0x374   : > { %v986_v31 = vadd.f32 %v985_v21, %v964_v9  ;;  %v998_v33 = vadd.f32 %v997_v26, %v996_v25  ;;  %1698 = vmatprep.subr.bf16.mxu0 %v2590_v0 }
 0x376   : > { %v994_v24 = vsub.f32 %v986_v31, %v993_v32  ;;  %v1014_v39 = vmul.f32 %v1656_v35, %v998_v33  ;;  %v1016_v40 = vmul.f32 %v1655_v34, %v998_v33 }
 0x377   : > { %1699 = vmatpush3.bf16.msra.mxu0 %v1916_v5 }
 0x378   : > { %v1007_v38 = vmul.f32 %v1655_v34, %v994_v24  ;;  %v1017_v41 = vmul.f32 %v1656_v35, %v994_v24 }
 0x37a   : > { %v1015_v43 = vsub.f32 %v1007_v38, %v1014_v39  ;;  %v1018_v44 = vadd.f32 %v1017_v41, %v1016_v40 }
 0x37c   : > { %v1040_v46 = vadd.f32 %v1039_v36, %v1015_v43  ;;  %v1044_v47 = vadd.f32 %v1043_v37, %v1018_v44 }
 0x37e   : > { %v1113_v48 = vmul.f32 %v1112_v45, %v1040_v46  ;;  %v1045_v49 = vpack.c.bf16 %v1040_v46, %v1040_v46  ;;  %v1048_v50 = vpack.c.bf16 %v1044_v47, %v1044_v47 }
 0x380   : > { %v3238_v51 = vadd.f32 %v1113_v48, %v3204_v1  ;;  %1047 = vst.msk [vmem:[%s3240_s4] sm:$0xf] %vm1046_vm6, %v1045_v49  ;;  %1049 = vst.msk [vmem:[%s3243_s7] sm:$0xf] %vm1046_vm6, %v1048_v50 }
 0x382   : > { %v1115_v22 = vsel %vm882_vm1, %v3238_v51, 0.0 }
 0x383   : > { %1116 = vadd.xlane.f32.xlu1 %v1115_v22 }
 0x410   : > { %v1117_v52 = vpop.xlane.xlu1 %1116 }
 0x411   : > { %v1118_v53 = vmul.f32 0.125, %v1117_v52 }
 0x413   : > { %v1119_v54 = vsub.f32 %v3238_v51, %v1118_v53 }
 0x415   : > { %v1120_v55 = vmul.f32 %v1119_v54, %v1119_v54 }
 0x417   : > { %v1121_v1 = vsel %vm882_vm1, %v1120_v55, 0.0 }
 0x418   : > { %1122 = vadd.xlane.f32.xlu1 %v1121_v1 }
 0x4a5   : > { %v1123_v58 = vpop.xlane.xlu1 %1122 }
 0x4a6   : > { %v1124_v59 = vmul.f32 0.125, %v1123_v58 }
 0x4a8   : > { %v1125_v60 = vadd.f32 1e-05, %v1124_v59 }
 0x4aa   : > { %1923 = vrsqrt.f32 %v1125_v60 }
 0x4b4   : > { %v1924_v61 = vpop.eup %1923 }
 0x4b5   : > { %v1127_v62 = vmul.f32 %v1924_v61, %v1119_v54 }
 0x4b7   : > { %v1128_v63 = vmul.f32 %v3220_v23, %v1127_v62 }
 0x4b9   : > { %v1129_v2 = vadd.f32 %v3223_v27, %v1128_v63 }
 0x4bb   : > { %v1130_v3 = vpack.c.bf16 %v1129_v2, %v1129_v2 }
 0x4bd   : > { %1693 = vmatmul.mubr.msk.bf16.vlgmr.msra.gmra.mrb[0].mxu1 %vm882_vm1, %v1130_v3 }
 0x590   : > { %v1179_v7 = vpop.f32.mrb[0].mxu1 }
 0x591   : > { %v1180_v8 = vadd.f32 %v1662_v6, %v1179_v7  ;;  %v1694_v9 = vpop.f32.mrb[1].mxu1 }
 0x592   : > { %v1182_v10 = vpop.f32.mrb[2].mxu1 }
 0x593   : > { %v1664_v23 = vmul.f32 -1.442695, %v1180_v8  ;;  %v1695_v27 = vpop.f32.mrb[3].mxu1 }
 0x595   : > { %1925 = vpow2.f32 %v1664_v23 }
 0x59f   : > { %v1926_v11 = vpop.eup %1925 }
 0x5a0   : > { %v1188_v12 = vadd.f32 1.0, %v1926_v11 }
 0x5a2   : > { %1927 = vrcp.f32 %v1188_v12 }
 0x5ac   : > { %v1928_v13 = vpop.eup %1927 }
 0x5ad   : > { %v1191_v0 = vmul.f32 %v1928_v13, %v1180_v8 }
 0x5af   : > { %v1192_v14 = vpack.c.bf16 %v1191_v0, %v1191_v0 }
 0x5b1   : > { %1701 = vmatmul.mubr.msk.bf16.vlgmr.msra.gmra.mrb[4].mxu0 %vm1216_vm7, %v1192_v14 }
 0x5b2   : > { %2424 = shalt.err (!%p2421_p4)
}
 0x5b3   : > { %s2425_s15 = scalar_lea.hbm %s3261_s20, 64  ;;  %s2429_s24 = scalar_lea.hbm %s3484_s26, 128 }
 0x5b4   : > { %p2426_p10 = scmp.ne.s32.totalorder %s3261_s20, %s2425_s15  ;;  %p2430_p12 = scmp.lt.u32.totalorder %s3261_s20, %s3484_s26 }
 0x5b5   : > { %p2431_p2 = scmp.lt.u32.totalorder %s2429_s24, %s2425_s15  ;;  %p2433_p6 = scmp.lt.u32.totalorder %s2425_s15, %s3261_s20 }
 0x5b6   : > { %p2427_p0 = pnand %p2426_p10, %p3485_p13 }
 0x5b7   : > { %p2432_p1 = por %p2431_p2, %p2430_p12 }
 0x5b8   : > { %p2428_p11 = pneg %p2427_p0 }
 0x5b9   : > { %p2434_p3 = por %p2433_p6, %p2432_p1 }
 0x5bb   : > { %p2435_p5 = pnand %p2434_p3, %p2428_p11 }
 0x5bd   : > { %2438 = shalt.err (!%p2435_p5)
}
 0x5be   : > { %1767 = dma.vmem_to_hbm [thread:$0]  (%p3485_p13), %s1300_s22, 64, %s3261_s20, %s3266_s27  }
 0x5bf   : > { %s3486_s17 = sld [smem:[#allocation65_spill]]  ;;  %s1312_s19 = sshll.u32 %s3243_s7, 4  ;;  %s1313_s19 = int_to_ptr.vmem [resolvable:$true] %s1312_s19 }
 0x5c0   : > { %s2439_s15 = scalar_lea.vmem %s1313_s19, 64  ;;  %s2593_s18 = smov [#allocation32]  }
 0x5c1   : > { %p2440_p7 = scmp.ne.s32.totalorder %s1313_s19, %s2439_s15  ;;  %s2443_s16 = sshll.u32 %s2593_s18, 4  ;;  %s2444_s16 = int_to_ptr.vmem [resolvable:$false] %s2443_s16 }
 0x5c2   : > { %s2445_s24 = scalar_lea.vmem %s2444_s16, 128  ;;  %p2446_p4 = scmp.lt.s32.totalorder %s1313_s19, %s2444_s16 }
 0x5c3   : > { %p2441_p8 = pnand %p2440_p7, %p3485_p13  ;;  %p2447_p10 = scmp.lt.s32.totalorder %s2445_s24, %s2439_s15 }
 0x5c5   : > { %s3291_s1 = scalar_lea.hbm %s3486_s17, %s1673_s5  ;;  %p2442_p9 = pneg %p2441_p8 }
 0x5c6   : > { %p2448_p0 = por %p2447_p10, %p2446_p4 }
 0x5c8   : > { %p2449_p11 = pnand %p2448_p0, %p2442_p9 }
 0x5ca   : > { %2452 = shalt.err (!%p2449_p11)
}
 0x5cb   : > { %s2453_s7 = scalar_lea.hbm %s3291_s1, 64  ;;  %s2457_s22 = scalar_lea.hbm %s3486_s17, 128 }
 0x5cc   : > { %p2454_p12 = scmp.ne.s32.totalorder %s3291_s1, %s2453_s7  ;;  %p2458_p6 = scmp.lt.u32.totalorder %s3291_s1, %s3486_s17 }
 0x5cd   : > { %p2459_p3 = scmp.lt.u32.totalorder %s2457_s22, %s2453_s7  ;;  %p2461_p7 = scmp.lt.u32.totalorder %s2453_s7, %s3291_s1 }
 0x5ce   : > { %p2455_p2 = pnand %p2454_p12, %p3485_p13 }
 0x5cf   : > { %p2460_p5 = por %p2459_p3, %p2458_p6 }
 0x5d0   : > { %p2456_p1 = pneg %p2455_p2 }
 0x5d1   : > { %p2462_p8 = por %p2461_p7, %p2460_p5 }
 0x5d3   : > { %p2463_p9 = pnand %p2462_p8, %p2456_p1 }
 0x5d5   : > { %2466 = shalt.err (!%p2463_p9)
}
 0x5d6   : > { %1768 = dma.vmem_to_hbm [thread:$0]  (%p3485_p13), %s1313_s19, 64, %s3291_s1, %s3266_s27   ;;  %v1665_v15 = vld [vmem:[#allocation28] ss:$0 sm:$0xff] }
 0x5d7   : > { %s1672_s28 = sshll.u32 %s2716_s2, 7  ;;  %s863_s3 = scalar_lea.vmem [#allocation29], %s1635_s29 }
 0x5d8   : > { %s1286_s15 = sshll.u32 %s863_s3, 4  ;;  %s3487_s24 = sld [smem:[#allocation63_spill]]  ;;  %s3321_s15 = int_to_ptr.vmem [resolvable:$true] %s1286_s15 }
 0x5d9   : > { %s1263_s2 = scalar_lea.sflag [#allocation4], %s3150_s14  ;;  %s2467_s29 = scalar_lea.vmem %s3321_s15, 128 }
 0x5da   : > { %p2468_p4 = scmp.ne.s32.totalorder %s3321_s15, %s2467_s29  ;;  %s2594_s27 = smov [#allocation29]  }
 0x5db   : > { %s2471_s1 = sshll.u32 %s2594_s27, 4  ;;  %s2472_s1 = int_to_ptr.vmem [resolvable:$false] %s2471_s1 }
 0x5dc   : > { %p2469_p10 = pnand %p2468_p4, %p3485_p13  ;;  %s2473_s19 = scalar_lea.vmem %s2472_s1, 256 }
 0x5dd   : > { %p2474_p11 = scmp.lt.s32.totalorder %s3321_s15, %s2472_s1  ;;  %p2475_p12 = scmp.lt.s32.totalorder %s2473_s19, %s2467_s29 }
 0x5de   : > { %s3319_s7 = scalar_lea.hbm %s3487_s24, %s1672_s28  ;;  %p2470_p0 = pneg %p2469_p10 }
 0x5df   : > { %p2476_p2 = por %p2475_p12, %p2474_p11 }
 0x5e1   : > { %p2477_p1 = pnand %p2476_p2, %p2470_p0 }
 0x684   : > { %v1254_v16 = vpop.f32.mrb[4].mxu0 }
 0x685   : > { %v1255_v17 = vadd.f32 %v1665_v15, %v1254_v16  ;;  %v1702_v18 = vpop.f32.mrb[5].mxu0 }
 0x686   : > { %v1257_v20 = vpop.f32.mrb[6].mxu0 }
 0x687   : > { %v1260_v21 = vadd.f32 %v1255_v17, %v3238_v51  ;;  %v1703_v25 = vpop.f32.mrb[7].mxu0 }
 0x689   : > { %1261 = vst.msk [vmem:[%s863_s3] sm:$0xff] %vm882_vm1, %v1260_v21 }
 0x68a   : > { %2480 = shalt.err (!%p2477_p1)
}
 0x68b   : > { %s2481_s14 = scalar_lea.hbm %s3319_s7, 128  ;;  %s2485_s22 = scalar_lea.hbm %s3487_s24, 256 }
 0x68c   : > { %p2482_p6 = scmp.ne.s32.totalorder %s3319_s7, %s2481_s14  ;;  %p2486_p7 = scmp.lt.u32.totalorder %s3319_s7, %s3487_s24 }
 0x68d   : > { %p2487_p8 = scmp.lt.u32.totalorder %s2485_s22, %s2481_s14  ;;  %p2489_p4 = scmp.lt.u32.totalorder %s2481_s14, %s3319_s7 }
 0x68e   : > { %p2483_p3 = pnand %p2482_p6, %p3485_p13 }
 0x68f   : > { %p2488_p9 = por %p2487_p8, %p2486_p7 }
 0x690   : > { %p2484_p5 = pneg %p2483_p3 }
 0x691   : > { %p2490_p10 = por %p2489_p4, %p2488_p9 }
 0x693   : > { %p2491_p0 = pnand %p2490_p10, %p2484_p5 }
 0x695   : > { %2494 = shalt.err (!%p2491_p0)
}
 0x696   : > { %1766 = dma.vmem_to_hbm [thread:$0]  (%p3485_p13), %s3321_s15, 128, %s3319_s7, %s1263_s2  }
 0x697 PF: > { %s3488_s28 = sld [smem:[#allocation48_spill]]  ;;  %s1324_s3 = sand.u32 1, %s2557_s0  }
 0x698   : > { %p3490_p12 = scmp.ge.s32.totalorder %s2569_s21, 2  ;;  %s1325_s18 = scalar_lea.sflag [#allocation4], %s1324_s3 }
 0x69d   : > { %p3489_p11 = scmp.ne.s32.totalorder %s3488_s28, 0 }
 0x69f   : > { %p1826_p2 = pnand %p3490_p12, %p3489_p11 }
 0x6a1   : > { %2548 = dma.done.wait (!%p1826_p2), %s1325_s18, 128  }
 0x6a2   : > { %2550 = vsyncadd (!%p1826_p2), %s1325_s18, 4294967168  ;;  %s3491_s16 = sadd.s32 4294967294, %s2569_s21  }
 0x6a3   : > { %s1333_s29 = sand.u32 1, %s3491_s16  }
 0x6a4   : > { %s1334_s27 = scalar_lea.sflag [#allocation31], %s1333_s29 }
 0x6a5   : > { %2552 = dma.done.wait (!%p1826_p2), %s1334_s27, 128  }
 0x6a6   : > { %2554 = vsyncadd (!%p1826_p2), %s1334_s27, 4294967168  ;;  %s3492_s21 = sld [smem:[#allocation46_spill]]  ;;  %s3493_s25 = sld [smem:[#allocation44_spill]] }
 0x6a7   : > { %s3494_s20 = sld [smem:[#allocation47_spill]]  ;;  %s3495_s0 = smov %s2561_s30 }
 0x6ac   : > { %p46_p13 = scmp.ge.s32.totalorder %s3492_s21, 4   ;;  %s3496_s30 = smov %s3493_s25 }
 0x6ae   :  { %48 = sbr.rel (!%p46_p13) target bundleno = 34 (0x22), region = 245 }
 0x6b5   :  { %1348 = vsyncpa [#allocation3], 1 }
 0x6b6   :  { %1350 = vsyncpa [#allocation3 + $0x1], 1 }
 0x6b7   :  { %1351 = vsyncpa [#allocation6], 1 }
 0x6b8   :  { %1353 = vsyncpa [#allocation6 + $0x1], 1 }
 0x6b9   :  { %1354 = vsyncpa [#allocation9], 1 }
 0x6ba   :  { %1355 = vsyncpa [#allocation12], 1 }
 0x6bb   :  { %1356 = vsyncpa [#allocation15], 1 }
 0x6bc   :  { %1357 = vsyncpa [#allocation18], 1 }
 0x6bd   :  { %1358 = vsyncpa [#allocation21], 1 }
 0x6be   :  { %1359 = vsyncpa [#allocation24], 1 }
 0x6bf   :  { %1360 = vsyncpa [#allocation27], 1 }
 0x6c0   :  { %1361 = vsyncpa [#allocation4], 1 }
 0x6c1   :  { %1363 = vsyncpa [#allocation4 + $0x1], 1 }
 0x6c2   :  { %1364 = vsyncpa [#allocation31], 1 }
 0x6c3   :  { %1366 = vsyncpa [#allocation31 + $0x1], 1 }

</bundles_post_ra>
